<compile_context>
chip_gen: v7x
topology: tpu7x:2x2x1
jax: 0.10.0
libtpu: 0.0.40
codegen_flags: <defaults>
</compile_context>

<pallas_src>
import functools
import math

import jax
import jax.numpy as jnp
from jax.experimental import pallas as pl
from jax.experimental.pallas import tpu as pltpu

LANE = 128


def _round_up(x, m):
    return ((x + m - 1) // m) * m


def _iterative_mlp_kernel(e_ref, w1_ref, b1_ref, w2_ref, b2_ref,
                          w3_ref, b3_ref, w4_ref, b4_ref, out_ref,
                          *, horizon):
    # e_ref: (TB * horizon, DP) f32, rows ordered (batch, horizon).
    x = e_ref[...]
    cdt = w1_ref.dtype  # bf16 compute dtype for MXU inputs

    # fc1 -> relu   (dropout is identity in eval mode)
    h1 = jnp.dot(x.astype(cdt), w1_ref[...],
                 preferred_element_type=jnp.float32) + b1_ref[...]
    h1 = jnp.maximum(h1, 0.0)
    # fc2 -> relu
    h2 = jnp.dot(h1.astype(cdt), w2_ref[...],
                 preferred_element_type=jnp.float32) + b2_ref[...]
    h2 = jnp.maximum(h2, 0.0)
    # fc3 -> sigmoid
    h3 = jnp.dot(h2.astype(cdt), w3_ref[...],
                 preferred_element_type=jnp.float32) + b3_ref[...]
    h3 = jax.nn.sigmoid(h3)                              # (TB*H, OUT_P)

    # Reduce over horizon (row index = b * horizon + h).
    tbh, out_p = h3.shape
    p = jnp.sum(h3.reshape(tbh // horizon, horizon, out_p), axis=1)  # (TB, OUT_P)

    # fc4 -> sigmoid.  Padded rows of W4 are zero, so the sigmoid(0)=0.5 padded
    # accumulator lanes contribute nothing to the real output columns.
    o = jnp.dot(p.astype(cdt), w4_ref[...],
                preferred_element_type=jnp.float32) + b4_ref[...]
    out_ref[...] = jax.nn.sigmoid(o)


def init_params(key, num=5):
    """f32 params matching nn.Linear shapes, stored (in_features, out_features)."""
    d_in = 2 * num + 1
    outsize = num * num
    dims = [(d_in, 1024), (1024, 512), (512, outsize), (outsize, outsize)]
    params = []
    for fan_in, fan_out in dims:
        key, kw, kb = jax.random.split(key, 3)
        bound = 1.0 / math.sqrt(fan_in)
        w = jax.random.uniform(kw, (fan_in, fan_out), jnp.float32, -bound, bound)
        b = jax.random.uniform(kb, (fan_out,), jnp.float32, -bound, bound)
        params += [w, b]
    return tuple(params)


def prepare_params(params, num=5, weight_dtype=jnp.bfloat16):
    """Zero-pad lane dims (11 -> 128 in, 25 -> 128 out) and cast weights to bf16."""
    w1, b1, w2, b2, w3, b3, w4, b4 = params
    d_in = 2 * num + 1
    outsize = num * num
    dp = _round_up(d_in, LANE)
    op = _round_up(outsize, LANE)

    w1p = jnp.zeros((dp, w1.shape[1]), weight_dtype).at[:d_in, :].set(
        w1.astype(weight_dtype))
    w2p = w2.astype(weight_dtype)
    w3p = jnp.zeros((w3.shape[0], op), weight_dtype).at[:, :outsize].set(
        w3.astype(weight_dtype))
    w4p = jnp.zeros((op, op), weight_dtype).at[:outsize, :outsize].set(
        w4.astype(weight_dtype))
    b1p = b1.reshape(1, -1).astype(jnp.float32)
    b2p = b2.reshape(1, -1).astype(jnp.float32)
    b3p = jnp.zeros((1, op), jnp.float32).at[0, :outsize].set(b3)
    b4p = jnp.zeros((1, op), jnp.float32).at[0, :outsize].set(b4)
    return (w1p, b1p, w2p, b2p, w3p, b3p, w4p, b4p)


def iterative_model_forward(s, a, prepared_params, *, horizon, num=5,
                            batch_tile=None):
    w1p, b1p, w2p, b2p, w3p, b3p, w4p, b4p = prepared_params
    d_in = 2 * num + 1
    outsize = num * num
    dp = w1p.shape[0]
    op = w4p.shape[1]
    B = s.shape[0]

    # --- glue (plain JAX): first difference along horizon + feature concat ---
    sp = s.reshape(B, horizon, num).astype(jnp.float32)
    sp = jnp.concatenate([sp[:, :1], sp[:, 1:] - sp[:, :-1]], axis=1)
    av = a.reshape(B, horizon, num + 1).astype(jnp.float32)
    e = jnp.concatenate([sp, av], axis=2)                 # (B, H, D)
    e = e.reshape(B * horizon, d_in)                      # row = b*H + h
    e = jnp.pad(e, ((0, 0), (0, dp - d_in)))              # lane-dense (B*H, DP)

    tb = B if batch_tile is None else batch_tile
    assert B % tb == 0, "batch_tile must divide the batch"
    grid = (B // tb,)

    m = B * horizon
    flops = int(2 * m * (dp * w1p.shape[1]
                         + w2p.shape[0] * w2p.shape[1]
                         + w3p.shape[0] * op)
                + 2 * B * op * op)
    transcendentals = int(m * op + B * op)
    bytes_accessed = int(e.size * e.dtype.itemsize
                         + sum(int(p.size) * p.dtype.itemsize
                               for p in prepared_params)
                         + B * op * 4)

    full = lambda arr: pl.BlockSpec(arr.shape, lambda i: (0, 0))

    out = pl.pallas_call(
        functools.partial(_iterative_mlp_kernel, horizon=horizon),
        out_shape=jax.ShapeDtypeStruct((B, op), jnp.float32),
        grid=grid,
        in_specs=[
            pl.BlockSpec((tb * horizon, dp), lambda i: (i, 0)),
            full(w1p), full(b1p), full(w2p), full(b2p),
            full(w3p), full(b3p), full(w4p), full(b4p),
        ],
        out_specs=pl.BlockSpec((tb, op), lambda i: (i, 0)),
        compiler_params=pltpu.CompilerParams(
            dimension_semantics=("parallel",)),   # batch tiles -> v7x dual TC
        cost_estimate=pl.CostEstimate(
            flops=flops, transcendentals=transcendentals,
            bytes_accessed=bytes_accessed),
    )(e, w1p, b1p, w2p, b2p, w3p, b3p, w4p, b4p)

    return out[:, :outsize]


def reference_forward(s, a, params, *, horizon, num=5,
                      weight_dtype=jnp.bfloat16):
    """Plain-JAX reference mirroring the kernel's bf16-weight / f32-accum math."""
    w1, b1, w2, b2, w3, b3, w4, b4 = params
    B = s.shape[0]
    sp = s.reshape(B, horizon, num).astype(jnp.float32)
    sp = jnp.concatenate([sp[:, :1], sp[:, 1:] - sp[:, :-1]], axis=1)
    av = a.reshape(B, horizon, num + 1).astype(jnp.float32)
    e = jnp.concatenate([sp, av], axis=2)

    def dot(x, w):
        return jnp.dot(x.astype(weight_dtype), w.astype(weight_dtype),
                       preferred_element_type=jnp.float32)

    p = jnp.zeros((B, num * num), jnp.float32)
    for h in range(horizon):
        x = e[:, h, :]
        h1 = jnp.maximum(dot(x, w1) + b1, 0.0)
        h2 = jnp.maximum(dot(h1, w2) + b2, 0.0)
        h3 = jax.nn.sigmoid(dot(h2, w3) + b3)
        p = p + h3
    return jax.nn.sigmoid(dot(p, w4) + b4)


if __name__ == "__main__":
    # Small shapes consistent with the module: num=5, horizon=8, batch=2.
    num = 5
    horizon = 8
    B = 2

    key = jax.random.PRNGKey(0)
    k_s, k_a, k_p = jax.random.split(key, 3)
    s = jax.random.normal(k_s, (B, horizon * num), jnp.float32)
    a = jax.random.normal(k_a, (B, horizon * (num + 1)), jnp.float32)
    params = init_params(k_p, num=num)
    prepared = prepare_params(params, num=num)

    # TODO(synk): nn.Dropout(0.3) is treated as identity (inference mode); the
    # cnn1/cnn2/cnn3 and ImageEncoder sub-modules are unused in the
    # images=False forward path, so they are not implemented here.

    out = iterative_model_forward(s, a, prepared, horizon=horizon, num=num)
    out = jax.block_until_ready(out)

    ref = reference_forward(s, a, params, horizon=horizon, num=num)
    assert out.shape == (B, num * num)
    max_err = float(jnp.max(jnp.abs(out - ref)))
    assert jnp.allclose(out, ref, atol=1e-4, rtol=1e-4), max_err
    print("KERNEL_OK")
</pallas_src>

<mosaic_0001>
module attributes {stable_mosaic.version = 11 : i64} {
  func.func @_iterative_mlp_kernel(%arg0: i32, %arg1: memref<16x128xf32, #tpu.memory_space<vmem>>, %arg2: memref<128x1024xbf16, #tpu.memory_space<vmem>>, %arg3: memref<1x1024xf32, #tpu.memory_space<vmem>>, %arg4: memref<1024x512xbf16, #tpu.memory_space<vmem>>, %arg5: memref<1x512xf32, #tpu.memory_space<vmem>>, %arg6: memref<512x128xbf16, #tpu.memory_space<vmem>>, %arg7: memref<1x128xf32, #tpu.memory_space<vmem>>, %arg8: memref<128x128xbf16, #tpu.memory_space<vmem>>, %arg9: memref<1x128xf32, #tpu.memory_space<vmem>>, %arg10: memref<2x128xf32, #tpu.memory_space<vmem>>) attributes {dimension_semantics = [#tpu.dimension_semantics<parallel>], iteration_bounds = array<i64: 1>, scalar_prefetch = 0 : i64, scratch_operands = 0 : i64, tpu.core_type = #tpu.core_type<tc>, window_params = [{transform_indices = @transform_0, window_bounds = array<i64: 16, 128>}, {pipeline_mode = #tpu.pipeline_mode<synchronous>, transform_indices = @transform_1, window_bounds = array<i64: 128, 1024>}, {pipeline_mode = #tpu.pipeline_mode<synchronous>, transform_indices = @transform_2, window_bounds = array<i64: 1, 1024>}, {pipeline_mode = #tpu.pipeline_mode<synchronous>, transform_indices = @transform_3, window_bounds = array<i64: 1024, 512>}, {pipeline_mode = #tpu.pipeline_mode<synchronous>, transform_indices = @transform_4, window_bounds = array<i64: 1, 512>}, {pipeline_mode = #tpu.pipeline_mode<synchronous>, transform_indices = @transform_5, window_bounds = array<i64: 512, 128>}, {pipeline_mode = #tpu.pipeline_mode<synchronous>, transform_indices = @transform_6, window_bounds = array<i64: 1, 128>}, {pipeline_mode = #tpu.pipeline_mode<synchronous>, transform_indices = @transform_7, window_bounds = array<i64: 128, 128>}, {pipeline_mode = #tpu.pipeline_mode<synchronous>, transform_indices = @transform_8, window_bounds = array<i64: 1, 128>}, {transform_indices = @transform_9, window_bounds = array<i64: 2, 128>}]} {
    %c0 = arith.constant 0 : index
    %c0_0 = arith.constant 0 : index
    %0 = vector.load %arg1[%c0, %c0_0] : memref<16x128xf32, #tpu.memory_space<vmem>>, vector<16x128xf32>
    %1 = arith.truncf %0 : vector<16x128xf32> to vector<16x128xbf16>
    %c0_1 = arith.constant 0 : index
    %c0_2 = arith.constant 0 : index
    %2 = vector.load %arg2[%c0_1, %c0_2] : memref<128x1024xbf16, #tpu.memory_space<vmem>>, vector<128x1024xbf16>
    %cst = arith.constant dense<0.000000e+00> : vector<16x1024xf32>
    %3 = tpu.matmul %1, %2, %cst {dimension_numbers = #tpu.dot_dimension_numbers<[1], [0], [0], [1], [0, 0, 1, 1], [], []>} : vector<16x128xbf16>, vector<128x1024xbf16>, vector<16x1024xf32> -> vector<16x1024xf32>
    %c0_3 = arith.constant 0 : index
    %c0_4 = arith.constant 0 : index
    %4 = vector.load %arg3[%c0_3, %c0_4] : memref<1x1024xf32, #tpu.memory_space<vmem>>, vector<1x1024xf32>
    %5 = vector.broadcast %4 : vector<1x1024xf32> to vector<16x1024xf32>
    %6 = arith.addf %3, %5 : vector<16x1024xf32>
    %cst_5 = arith.constant 0.000000e+00 : f32
    %7 = vector.broadcast %cst_5 : f32 to vector<16x1024xf32>
    %8 = arith.maximumf %6, %7 : vector<16x1024xf32>
    %9 = arith.truncf %8 : vector<16x1024xf32> to vector<16x1024xbf16>
    %c0_6 = arith.constant 0 : index
    %c0_7 = arith.constant 0 : index
    %10 = vector.load %arg4[%c0_6, %c0_7] : memref<1024x512xbf16, #tpu.memory_space<vmem>>, vector<1024x512xbf16>
    %cst_8 = arith.constant dense<0.000000e+00> : vector<16x512xf32>
    %11 = tpu.matmul %9, %10, %cst_8 {dimension_numbers = #tpu.dot_dimension_numbers<[1], [0], [0], [1], [0, 0, 1, 1], [], []>} : vector<16x1024xbf16>, vector<1024x512xbf16>, vector<16x512xf32> -> vector<16x512xf32>
    %c0_9 = arith.constant 0 : index
    %c0_10 = arith.constant 0 : index
    %12 = vector.load %arg5[%c0_9, %c0_10] : memref<1x512xf32, #tpu.memory_space<vmem>>, vector<1x512xf32>
    %13 = vector.broadcast %12 : vector<1x512xf32> to vector<16x512xf32>
    %14 = arith.addf %11, %13 : vector<16x512xf32>
    %cst_11 = arith.constant 0.000000e+00 : f32
    %15 = vector.broadcast %cst_11 : f32 to vector<16x512xf32>
    %16 = arith.maximumf %14, %15 : vector<16x512xf32>
    %17 = arith.truncf %16 : vector<16x512xf32> to vector<16x512xbf16>
    %c0_12 = arith.constant 0 : index
    %c0_13 = arith.constant 0 : index
    %18 = vector.load %arg6[%c0_12, %c0_13] : memref<512x128xbf16, #tpu.memory_space<vmem>>, vector<512x128xbf16>
    %cst_14 = arith.constant dense<0.000000e+00> : vector<16x128xf32>
    %19 = tpu.matmul %17, %18, %cst_14 {dimension_numbers = #tpu.dot_dimension_numbers<[1], [0], [0], [1], [0, 0, 1, 1], [], []>} : vector<16x512xbf16>, vector<512x128xbf16>, vector<16x128xf32> -> vector<16x128xf32>
    %c0_15 = arith.constant 0 : index
    %c0_16 = arith.constant 0 : index
    %20 = vector.load %arg7[%c0_15, %c0_16] : memref<1x128xf32, #tpu.memory_space<vmem>>, vector<1x128xf32>
    %21 = vector.broadcast %20 : vector<1x128xf32> to vector<16x128xf32>
    %22 = arith.addf %19, %21 : vector<16x128xf32>
    %23 = arith.negf %22 : vector<16x128xf32>
    %24 = math.exp %23 : vector<16x128xf32>
    %cst_17 = arith.constant 1.000000e+00 : f32
    %25 = vector.broadcast %cst_17 : f32 to vector<16x128xf32>
    %26 = arith.addf %25, %24 : vector<16x128xf32>
    %27 = arith.divf %25, %26 : vector<16x128xf32>
    %28 = vector.shape_cast %27 : vector<16x128xf32> to vector<2x8x128xf32>
    %cst_18 = arith.constant dense<0.000000e+00> : vector<2x128xf32>
    %29 = vector.multi_reduction <add>, %28, %cst_18 [1] : vector<2x8x128xf32> to vector<2x128xf32>
    %30 = arith.truncf %29 : vector<2x128xf32> to vector<2x128xbf16>
    %c0_19 = arith.constant 0 : index
    %c0_20 = arith.constant 0 : index
    %31 = vector.load %arg8[%c0_19, %c0_20] : memref<128x128xbf16, #tpu.memory_space<vmem>>, vector<128x128xbf16>
    %cst_21 = arith.constant dense<0.000000e+00> : vector<2x128xf32>
    %32 = tpu.matmul %30, %31, %cst_21 {dimension_numbers = #tpu.dot_dimension_numbers<[1], [0], [0], [1], [0, 0, 1, 1], [], []>} : vector<2x128xbf16>, vector<128x128xbf16>, vector<2x128xf32> -> vector<2x128xf32>
    %c0_22 = arith.constant 0 : index
    %c0_23 = arith.constant 0 : index
    %33 = vector.load %arg9[%c0_22, %c0_23] : memref<1x128xf32, #tpu.memory_space<vmem>>, vector<1x128xf32>
    %34 = vector.broadcast %33 : vector<1x128xf32> to vector<2x128xf32>
    %35 = arith.addf %32, %34 : vector<2x128xf32>
    %36 = arith.negf %35 : vector<2x128xf32>
    %37 = math.exp %36 : vector<2x128xf32>
    %cst_24 = arith.constant 1.000000e+00 : f32
    %38 = vector.broadcast %cst_24 : f32 to vector<2x128xf32>
    %39 = arith.addf %38, %37 : vector<2x128xf32>
    %40 = arith.divf %38, %39 : vector<2x128xf32>
    %c0_25 = arith.constant 0 : index
    %c0_26 = arith.constant 0 : index
    %41 = vector.load %arg10[%c0_25, %c0_26] : memref<2x128xf32, #tpu.memory_space<vmem>>, vector<2x128xf32>
    tpu.vector_store %arg10[%c0_25, %c0_26], %40 {strides = array<i32>} : memref<2x128xf32, #tpu.memory_space<vmem>>, vector<2x128xf32>,
    return
  }
  func.func @transform_0(%arg0: i32) -> (i32, i32) {
    %c0_i32 = arith.constant 0 : i32
    %c0_i32_0 = arith.constant 0 : i32
    return %arg0, %c0_i32 : i32, i32
  }
  func.func @transform_1(%arg0: i32) -> (i32, i32) {
    %c0_i32 = arith.constant 0 : i32
    %c0_i32_0 = arith.constant 0 : i32
    %c0_i32_1 = arith.constant 0 : i32
    return %c0_i32, %c0_i32_0 : i32, i32
  }
  func.func @transform_2(%arg0: i32) -> (i32, i32) {
    %c0_i32 = arith.constant 0 : i32
    %c0_i32_0 = arith.constant 0 : i32
    %c0_i32_1 = arith.constant 0 : i32
    return %c0_i32, %c0_i32_0 : i32, i32
  }
  func.func @transform_3(%arg0: i32) -> (i32, i32) {
    %c0_i32 = arith.constant 0 : i32
    %c0_i32_0 = arith.constant 0 : i32
    %c0_i32_1 = arith.constant 0 : i32
    return %c0_i32, %c0_i32_0 : i32, i32
  }
  func.func @transform_4(%arg0: i32) -> (i32, i32) {
    %c0_i32 = arith.constant 0 : i32
    %c0_i32_0 = arith.constant 0 : i32
    %c0_i32_1 = arith.constant 0 : i32
    return %c0_i32, %c0_i32_0 : i32, i32
  }
  func.func @transform_5(%arg0: i32) -> (i32, i32) {
    %c0_i32 = arith.constant 0 : i32
    %c0_i32_0 = arith.constant 0 : i32
    %c0_i32_1 = arith.constant 0 : i32
    return %c0_i32, %c0_i32_0 : i32, i32
  }
  func.func @transform_6(%arg0: i32) -> (i32, i32) {
    %c0_i32 = arith.constant 0 : i32
    %c0_i32_0 = arith.constant 0 : i32
    %c0_i32_1 = arith.constant 0 : i32
    return %c0_i32, %c0_i32_0 : i32, i32
  }
  func.func @transform_7(%arg0: i32) -> (i32, i32) {
    %c0_i32 = arith.constant 0 : i32
    %c0_i32_0 = arith.constant 0 : i32
    %c0_i32_1 = arith.constant 0 : i32
    return %c0_i32, %c0_i32_0 : i32, i32
  }
  func.func @transform_8(%arg0: i32) -> (i32, i32) {
    %c0_i32 = arith.constant 0 : i32
    %c0_i32_0 = arith.constant 0 : i32
    %c0_i32_1 = arith.constant 0 : i32
    return %c0_i32, %c0_i32_0 : i32, i32
  }
  func.func @transform_9(%arg0: i32) -> (i32, i32) {
    %c0_i32 = arith.constant 0 : i32
    %c0_i32_0 = arith.constant 0 : i32
    return %arg0, %c0_i32 : i32, i32
  }
}

</mosaic_0001>

<bundles_post_ra>
// kernel: tpu_custom_call.1
= control target key start
LH: loop header
LB: loop body
LE: loop exit
PB: predicated region body
PF: predicated region fallthrough
CT: control target
= control target key end

     0   :  { %14 = vsyncpa [#allocation3], 0  ;;  %s4483_s0 = inlined_call_operand.hbm [shape: f32[16,128], index: 0, kind: input, shape index: {}]   ;;  %s4484_s1 = inlined_call_operand.hbm [shape: bf16[128,1024], index: 1, kind: input, shape index: {}]   ;;  %s4485_s2 = inlined_call_operand.hbm [shape: f32[1,1024], index: 2, kind: input, shape index: {}]   ;;  %s4486_s3 = inlined_call_operand.hbm [shape: bf16[1024,512], index: 3, kind: input, shape index: {}]   ;;  %s4487_s4 = inlined_call_operand.vmem [shape: f32[1,512], index: 4, kind: input, shape index: {}]   ;;  %s4488_s5 = inlined_call_operand.hbm [shape: bf16[512,128], index: 5, kind: input, shape index: {}]   ;;  %s4489_s6 = inlined_call_operand.vmem [shape: f32[1,128], index: 6, kind: input, shape index: {}]   ;;  %s4490_s7 = inlined_call_operand.hbm [shape: bf16[128,128], index: 7, kind: input, shape index: {}]   ;;  %s4491_s8 = inlined_call_operand.vmem [shape: f32[1,128], index: 8, kind: input, shape index: {}]   ;;  %s4492_s9 = inlined_call_operand.hbm [shape: f32[2,128], index: 9, kind: output, shape index: {}]  }
   0x1   :  { %15 = vsyncpa [#allocation6], 0 }
   0x2   :  { %16 = vsyncpa [#allocation9], 0 }
   0x3   :  { %17 = vsyncpa [#allocation12], 0 }
   0x4   :  { %18 = vsyncpa [#allocation4], 0  ;;  %s4256_s30 = smov [#allocation5]   ;;  %s4092_s13 = scalar_lea.hbm %s4484_s1, 8192 }
   0x5   :  { %s36_s10 = sshll.u32 %s4256_s30, 4  ;;  %p4093_p0 = scmp.ne.s32.totalorder %s4484_s1, %s4092_s13  ;;  %s37_s10 = int_to_ptr.vmem [resolvable:$true] %s36_s10 }
   0x6   :  { %p4096_p1 = scmp.lt.u32.totalorder %s4092_s13, %s4484_s1 }
   0x8   :  { %p4098_p2 = pnand %p4096_p1, %p4093_p0 }
   0xa   :  { %4101 = shalt.err (!%p4098_p2)
}
   0xb   :  { %s4102_s18 = scalar_lea.vmem %s37_s10, 8192  ;;  %p4107_p4 = scmp.lt.s32.totalorder %s37_s10, %s37_s10 }
   0xc   :  { %p4103_p3 = scmp.ne.s32.totalorder %s37_s10, %s4102_s18  ;;  %p4108_p5 = scmp.lt.s32.totalorder %s4102_s18, %s4102_s18 }
   0xe   :  { %p4109_p6 = por %p4108_p5, %p4107_p4 }
  0x10   :  { %p4110_p7 = pnand %p4109_p6, %p4103_p3 }
  0x12   :  { %4113 = shalt.err (!%p4110_p7)
}
  0x13   :  { %s4257_s19 = smov 512   ;;  %s4258_s20 = smov 32  }
  0x14   :  { %42 = dma.hbm_to_vmem [thread:$0]  %s4484_s1, 8192, %s37_s10, [#allocation6], %s4257_s19, %s4257_s19, %s4258_s20  }
  0x15   :  { %s4259_s23 = smov [#allocation8]   ;;  %s4114_s27 = scalar_lea.hbm %s4486_s3, 32768 }
  0x16   :  { %s58_s24 = sshll.u32 %s4259_s23, 4  ;;  %p4115_p8 = scmp.ne.s32.totalorder %s4486_s3, %s4114_s27  ;;  %s59_s24 = int_to_ptr.vmem [resolvable:$true] %s58_s24 }
  0x17   :  { %p4118_p9 = scmp.lt.u32.totalorder %s4114_s27, %s4486_s3 }
  0x19   :  { %p4120_p10 = pnand %p4118_p9, %p4115_p8 }
  0x1b   :  { %4123 = shalt.err (!%p4120_p10)
}
  0x1c   :  { %s4124_s12 = scalar_lea.vmem %s59_s24, 32768  ;;  %p4129_p12 = scmp.lt.s32.totalorder %s59_s24, %s59_s24 }
  0x1d   :  { %p4125_p11 = scmp.ne.s32.totalorder %s59_s24, %s4124_s12  ;;  %p4130_p13 = scmp.lt.s32.totalorder %s4124_s12, %s4124_s12 }
  0x1f   :  { %p4131_p0 = por %p4130_p13, %p4129_p12 }
  0x21   :  { %p4132_p1 = pnand %p4131_p0, %p4125_p11 }
  0x23   :  { %4135 = shalt.err (!%p4132_p1)
}
  0x24   :  { %s4260_s1 = smov 256   ;;  %s4261_s10 = smov 16  }
  0x25   :  { %64 = dma.hbm_to_vmem [thread:$0]  %s4486_s3, 32768, %s59_s24, [#allocation9], %s4260_s1, %s4260_s1, %s4261_s10  }
  0x26   :  { %s4262_s15 = smov [#allocation2]   ;;  %s4136_s19 = scalar_lea.hbm %s4483_s0, 256 }
  0x27   :  { %s24_s16 = sshll.u32 %s4262_s15, 4  ;;  %p4137_p2 = scmp.ne.s32.totalorder %s4483_s0, %s4136_s19  ;;  %s25_s16 = int_to_ptr.vmem [resolvable:$true] %s24_s16 }
  0x28   :  { %p4140_p3 = scmp.lt.u32.totalorder %s4136_s19, %s4483_s0 }
  0x2a   :  { %p4142_p4 = pnand %p4140_p3, %p4137_p2 }
  0x2c   :  { %4145 = shalt.err (!%p4142_p4)
}
  0x2d   :  { %s4146_s25 = scalar_lea.vmem %s25_s16, 256  ;;  %p4151_p6 = scmp.lt.s32.totalorder %s25_s16, %s25_s16 }
  0x2e   :  { %p4147_p5 = scmp.ne.s32.totalorder %s25_s16, %s4146_s25  ;;  %p4152_p7 = scmp.lt.s32.totalorder %s4146_s25, %s4146_s25 }
  0x30   :  { %p4153_p8 = por %p4152_p7, %p4151_p6 }
  0x32   :  { %p4154_p9 = pnand %p4153_p8, %p4147_p5 }
  0x34   :  { %4157 = shalt.err (!%p4154_p9)
}
  0x35   :  { %s4263_s3 = smov 128   ;;  %s4264_s24 = smov 8  }
  0x36   :  { %30 = dma.hbm_to_vmem [thread:$0]  %s4483_s0, 256, %s25_s16, [#allocation3], %s4263_s3, %s4263_s3, %s4264_s24  }
  0x37   :  { %s4265_s28 = smov [#allocation7]   ;;  %s4266_s30 = smov [#allocation10]  }
  0x38   :  { %s49_s29 = sshll.u32 %s4265_s28, 4  ;;  %s72_s11 = sshll.u32 %s4266_s30, 4  ;;  %s50_s29 = int_to_ptr.vmem [resolvable:$true] %s49_s29  ;;  %s73_s11 = int_to_ptr.vmem [resolvable:$true] %s72_s11 }
  0x39   :  { %s4158_s10 = scalar_lea.hbm %s4485_s2, 128 }
  0x3a   :  { %p4159_p10 = scmp.ne.s32.totalorder %s4485_s2, %s4158_s10  ;;  %p4162_p11 = scmp.lt.u32.totalorder %s4158_s10, %s4485_s2 }
  0x3c   :  { %p4164_p12 = pnand %p4162_p11, %p4159_p10 }
  0x3e   :  { %4167 = shalt.err (!%p4164_p12)
}
  0x3f   :  { %s4168_s0 = scalar_lea.vmem %s50_s29, 128  ;;  %p4173_p0 = scmp.lt.s32.totalorder %s50_s29, %s50_s29 }
  0x40   :  { %p4169_p13 = scmp.ne.s32.totalorder %s50_s29, %s4168_s0  ;;  %p4174_p1 = scmp.lt.s32.totalorder %s4168_s0, %s4168_s0 }
  0x42   :  { %p4175_p2 = por %p4174_p1, %p4173_p0 }
  0x44   :  { %p4176_p3 = pnand %p4175_p2, %p4169_p13 }
  0x46   :  { %4179 = shalt.err (!%p4176_p3)
}
  0x47   :  { %52 = dma.hbm_to_vmem [thread:$0]  %s4485_s2, 128, %s50_s29, [#allocation6]  }
  0x48   :  { %s4180_s21 = scalar_lea.hbm %s4488_s5, 4096 }
  0x49   :  { %p4181_p4 = scmp.ne.s32.totalorder %s4488_s5, %s4180_s21  ;;  %p4184_p5 = scmp.lt.u32.totalorder %s4180_s21, %s4488_s5 }
  0x4b   :  { %p4186_p6 = pnand %p4184_p5, %p4181_p4 }
  0x4d   :  { %4189 = shalt.err (!%p4186_p6)
}
  0x4e   :  { %s4190_s24 = scalar_lea.vmem %s73_s11, 4096  ;;  %p4195_p8 = scmp.lt.s32.totalorder %s73_s11, %s73_s11 }
  0x4f   :  { %p4191_p7 = scmp.ne.s32.totalorder %s73_s11, %s4190_s24  ;;  %p4196_p9 = scmp.lt.s32.totalorder %s4190_s24, %s4190_s24 }
  0x51   :  { %p4197_p10 = por %p4196_p9, %p4195_p8 }
  0x53   :  { %p4198_p11 = pnand %p4197_p10, %p4191_p7 }
  0x55   :  { %4201 = shalt.err (!%p4198_p11)
}
  0x56   :  { %s4267_s2 = smov 64   ;;  %s4268_s26 = smov 4  }
  0x57   :  { %78 = dma.hbm_to_vmem [thread:$0]  %s4488_s5, 4096, %s73_s11, [#allocation9], %s4267_s2, %s4267_s2, %s4268_s26  }
  0x58   :  { %s4269_s29 = smov [#allocation11]   ;;  %s4202_s10 = scalar_lea.hbm %s4490_s7, 1024 }
  0x59   :  { %s86_s30 = sshll.u32 %s4269_s29, 4  ;;  %p4203_p12 = scmp.ne.s32.totalorder %s4490_s7, %s4202_s10  ;;  %s87_s30 = int_to_ptr.vmem [resolvable:$true] %s86_s30 }
  0x5a   :  { %p4206_p13 = scmp.lt.u32.totalorder %s4202_s10, %s4490_s7 }
  0x5c   :  { %p4208_p0 = pnand %p4206_p13, %p4203_p12 }
  0x5e   :  { %4211 = shalt.err (!%p4208_p0)
}
  0x5f   :  { %s4212_s0 = scalar_lea.vmem %s87_s30, 1024  ;;  %p4217_p2 = scmp.lt.s32.totalorder %s87_s30, %s87_s30 }
  0x60   :  { %p4213_p1 = scmp.ne.s32.totalorder %s87_s30, %s4212_s0  ;;  %p4218_p3 = scmp.lt.s32.totalorder %s4212_s0, %s4212_s0 }
  0x62   :  { %p4219_p4 = por %p4218_p3, %p4217_p2 }
  0x64   :  { %p4220_p5 = pnand %p4219_p4, %p4213_p1 }
  0x66   :  { %4223 = shalt.err (!%p4220_p5)
}
  0x67   :  { %92 = dma.hbm_to_vmem [thread:$0]  %s4490_s7, 1024, %s87_s30, [#allocation12], %s4267_s2, %s4267_s2, %s4268_s26  }
  0x68   :  { %4246 = dma.done.wait [#allocation3], 256  }
  0x69   :  { %4247 = vsyncadd [#allocation3], 4294967040 }
  0x6a   :  { %4248 = dma.done.wait [#allocation6], 8320  }
  0x6b   :  { %4249 = vsyncadd [#allocation6], 4294958976 }
  0x6c   :  { %4250 = dma.done.wait [#allocation9], 36864  }
  0x6d   :  { %4251 = vsyncadd [#allocation9], 4294930432 }
  0x6e   :  { %4252 = dma.done.wait [#allocation12], 1024  }
  0x6f   :  { %4253 = vsyncadd [#allocation12], 4294966272  ;;  %v4270_v0 = vmov 0   ;;  %v117_v1 = vld [vmem:[#allocation5] sm:$0xff]  ;;  %v118_v14 = vld [vmem:[#allocation5 + $0x8] sm:$0xff]  ;;  %vm4272_vm0 = vmmov 0  }
  0x70   :  { %575 = vmatprep.mubr.bf16.mxu0 %v4270_v0  ;;  %618 = vmatprep.mubr.bf16.mxu1 %v4270_v0  ;;  %v121_v2 = vld [vmem:[#allocation5 + $0x20] sm:$0xff]  ;;  %v122_v15 = vld [vmem:[#allocation5 + $0x28] sm:$0xff]  ;;  %v119_v57 = vld [vmem:[#allocation5 + $0x10] sm:$0xff]  ;;  %vm3051_vm1 = vcmask 1041409   ;;  %s4273_s20 = smov [#allocation13]  }
  0x71   :  { %v125_v3 = vld [vmem:[#allocation5 + $0x40] sm:$0xff]  ;;  %v3169_v4 = vcombine.high %v117_v1, %v121_v2  ;;  %v3168_v5 = vcombine.low %v117_v1, %v121_v2  ;;  %v126_v16 = vld [vmem:[#allocation5 + $0x48] sm:$0xff]  ;;  %v3171_v17 = vcombine.high %v118_v14, %v122_v15  ;;  %v3170_v18 = vcombine.low %v118_v14, %v122_v15  ;;  %v114_v58 = vld [vmem:[#allocation2] sm:$0xff]  ;;  %s3156_s21 = sshll.u32 %s4273_s20, 4  ;;  %s3157_s21 = int_to_ptr.vmem [resolvable:$true] %s3156_s21 }
  0x72   :  { %v129_v6 = vld [vmem:[#allocation5 + $0x60] sm:$0xff]  ;;  %v130_v19 = vld [vmem:[#allocation5 + $0x68] sm:$0xff]  ;;  %v123_v60 = vld [vmem:[#allocation5 + $0x30] sm:$0xff]  ;;  %s4224_s22 = scalar_lea.vmem %s3157_s21, 32  ;;  %p4229_p7 = scmp.lt.s32.totalorder %s3157_s21, %s3157_s21 }
  0x73   :  { %v3177_v7 = vcombine.high %v125_v3, %v129_v6  ;;  %v133_v8 = vld [vmem:[#allocation5 + $0x80] sm:$0xff]  ;;  %543 = vmatprep.subr.bf16.mxu0 %v3169_v4  ;;  %v3176_v10 = vcombine.low %v125_v3, %v129_v6  ;;  %v3179_v21 = vcombine.high %v126_v16, %v130_v19  ;;  %v134_v22 = vld [vmem:[#allocation5 + $0x88] sm:$0xff]  ;;  %586 = vmatprep.subr.bf16.mxu1 %v3171_v17  ;;  %v115_v61 = vld [vmem:[#allocation2 + $0x8] sm:$0xff]  ;;  %p4225_p6 = scmp.ne.s32.totalorder %s3157_s21, %s4224_s22  ;;  %p4230_p8 = scmp.lt.s32.totalorder %s4224_s22, %s4224_s22 }
  0x74   :  { %v137_v9 = vld [vmem:[#allocation5 + $0xa0] sm:$0xff]  ;;  %544 = vmatpush1.bf16.msra.mxu0 %v3168_v5  ;;  %v138_v23 = vld [vmem:[#allocation5 + $0xa8] sm:$0xff]  ;;  %587 = vmatpush1.bf16.msra.mxu1 %v3170_v18  ;;  %v3178_v27 = vcombine.low %v126_v16, %v130_v19  ;;  %v3173_v3 = vcombine.high %v119_v57, %v123_v60  ;;  %v127_v4 = vld [vmem:[#allocation5 + $0x50] sm:$0xff] }
  0x75   :  { %545 = vmatprep.subr.bf16.mxu0 %v3177_v7  ;;  %v3185_v11 = vcombine.high %v133_v8, %v137_v9  ;;  %v141_v12 = vld [vmem:[#allocation5 + $0xc0] sm:$0xff]  ;;  %v3184_v20 = vcombine.low %v133_v8, %v137_v9  ;;  %588 = vmatprep.subr.bf16.mxu1 %v3179_v21  ;;  %v3187_v28 = vcombine.high %v134_v22, %v138_v23  ;;  %v142_v30 = vld [vmem:[#allocation5 + $0xc8] sm:$0xff]  ;;  %v131_v6 = vld [vmem:[#allocation5 + $0x70] sm:$0xff]  ;;  %p4231_p9 = por %p4230_p8, %p4229_p7 }
  0x76   :  { %v145_v13 = vld [vmem:[#allocation5 + $0xe0] sm:$0xff]  ;;  %v146_v31 = vld [vmem:[#allocation5 + $0xe8] sm:$0xff]  ;;  %v3186_v35 = vcombine.low %v134_v22, %v138_v23  ;;  %v4398_v7 = vpack.c.bf16 %v115_v61, %v114_v58  ;;  %v3172_v9 = vcombine.low %v119_v57, %v123_v60  ;;  %v139_v15 = vld [vmem:[#allocation5 + $0xb0] sm:$0xff]  ;;  %v3180_v17 = vcombine.low %v127_v4, %v131_v6 }
  0x77   :  { %v3193_v24 = vcombine.high %v141_v12, %v145_v13  ;;  %v149_v25 = vld [vmem:[#allocation5 + $0x100] sm:$0xff]  ;;  %v3192_v29 = vcombine.low %v141_v12, %v145_v13  ;;  %v3195_v36 = vcombine.high %v142_v30, %v146_v31  ;;  %v150_v38 = vld [vmem:[#allocation5 + $0x108] sm:$0xff]  ;;  %v3194_v43 = vcombine.low %v142_v30, %v146_v31  ;;  %v135_v13 = vld [vmem:[#allocation5 + $0x90] sm:$0xff]  ;;  %p4232_p10 = pnand %p4231_p9, %p4225_p6 }
  0x78   :  { %546 = vmatpush1.bf16.msra.mxu0 %v3176_v10  ;;  %v153_v26 = vld [vmem:[#allocation5 + $0x120] sm:$0xff]  ;;  %589 = vmatpush1.bf16.msra.mxu1 %v3178_v27  ;;  %v154_v39 = vld [vmem:[#allocation5 + $0x128] sm:$0xff]  ;;  %v120_v10 = vld [vmem:[#allocation5 + $0x18] sm:$0xff]  ;;  %v3181_v12 = vcombine.high %v127_v4, %v131_v6 }
  0x79   :  { %547 = vmatprep.subr.bf16.mxu0 %v3185_v11  ;;  %v3201_v32 = vcombine.high %v149_v25, %v153_v26  ;;  %v157_v33 = vld [vmem:[#allocation5 + $0x140] sm:$0xff]  ;;  %590 = vmatprep.subr.bf16.mxu1 %v3187_v28  ;;  %v3200_v37 = vcombine.low %v149_v25, %v153_v26  ;;  %v3203_v44 = vcombine.high %v150_v38, %v154_v39  ;;  %v158_v46 = vld [vmem:[#allocation5 + $0x148] sm:$0xff]  ;;  %v124_v11 = vld [vmem:[#allocation5 + $0x38] sm:$0xff] }
  0x7a   :  { %v161_v34 = vld [vmem:[#allocation5 + $0x160] sm:$0xff]  ;;  %v162_v47 = vld [vmem:[#allocation5 + $0x168] sm:$0xff]  ;;  %v3202_v51 = vcombine.low %v150_v38, %v154_v39  ;;  %v3175_v16 = vcombine.high %v120_v10, %v124_v11  ;;  %v128_v18 = vld [vmem:[#allocation5 + $0x58] sm:$0xff]  ;;  %v3174_v23 = vcombine.low %v120_v10, %v124_v11  ;;  %v3188_v25 = vcombine.low %v135_v13, %v139_v15 }
  0x7b   :  { %v3209_v40 = vcombine.high %v157_v33, %v161_v34  ;;  %v165_v41 = vld [vmem:[#allocation5 + $0x180] sm:$0xff]  ;;  %v3208_v45 = vcombine.low %v157_v33, %v161_v34  ;;  %v3211_v52 = vcombine.high %v158_v46, %v162_v47  ;;  %v166_v54 = vld [vmem:[#allocation5 + $0x188] sm:$0xff]  ;;  %v3210_v59 = vcombine.low %v158_v46, %v162_v47  ;;  %v132_v19 = vld [vmem:[#allocation5 + $0x78] sm:$0xff] }
  0x7c   :  { %548 = vmatpush1.bf16.msra.mxu0 %v3184_v20  ;;  %v169_v42 = vld [vmem:[#allocation5 + $0x1a0] sm:$0xff]  ;;  %591 = vmatpush1.bf16.msra.mxu1 %v3186_v35  ;;  %v170_v55 = vld [vmem:[#allocation5 + $0x1a8] sm:$0xff]  ;;  %v3189_v20 = vcombine.high %v135_v13, %v139_v15  ;;  %v143_v21 = vld [vmem:[#allocation5 + $0xd0] sm:$0xff]  ;;  %v3182_v31 = vcombine.low %v128_v18, %v132_v19 }
  0x7d   :  { %549 = vmatprep.subr.bf16.mxu0 %v3193_v24  ;;  %592 = vmatprep.subr.bf16.mxu1 %v3195_v36  ;;  %v3217_v48 = vcombine.high %v165_v41, %v169_v42  ;;  %v173_v49 = vld [vmem:[#allocation5 + $0x1c0] sm:$0xff]  ;;  %v3216_v53 = vcombine.low %v165_v41, %v169_v42  ;;  %v3219_v62 = vcombine.high %v166_v54, %v170_v55  ;;  %v174_v1 = vld [vmem:[#allocation5 + $0x1c8] sm:$0xff]  ;;  %v147_v22 = vld [vmem:[#allocation5 + $0xf0] sm:$0xff] }
  0x7e   :  { %v177_v50 = vld [vmem:[#allocation5 + $0x1e0] sm:$0xff]  ;;  %v178_v2 = vld [vmem:[#allocation5 + $0x1e8] sm:$0xff]  ;;  %v3218_v5 = vcombine.low %v166_v54, %v170_v55  ;;  %v3183_v24 = vcombine.high %v128_v18, %v132_v19  ;;  %v136_v26 = vld [vmem:[#allocation5 + $0x98] sm:$0xff]  ;;  %v3197_v28 = vcombine.high %v143_v21, %v147_v22  ;;  %v3196_v33 = vcombine.low %v143_v21, %v147_v22 }
  0x7f   :  { %v3225_v56 = vcombine.high %v173_v49, %v177_v50  ;;  %v3224_v63 = vcombine.low %v173_v49, %v177_v50  ;;  %v3227_v8 = vcombine.high %v174_v1, %v178_v2  ;;  %v3226_v14 = vcombine.low %v174_v1, %v178_v2  ;;  %v140_v27 = vld [vmem:[#allocation5 + $0xb8] sm:$0xff]  ;;  %v155_v30 = vld [vmem:[#allocation5 + $0x130] sm:$0xff] }
  0x80   :  { %550 = vmatpush1.bf16.msra.mxu0 %v3192_v29  ;;  %593 = vmatpush1.bf16.msra.mxu1 %v3194_v43  ;;  %v151_v29 = vld [vmem:[#allocation5 + $0x110] sm:$0xff]  ;;  %v144_v34 = vld [vmem:[#allocation5 + $0xd8] sm:$0xff]  ;;  %v3190_v39 = vcombine.low %v136_v26, %v140_v27 }
  0x81   :  { %551 = vmatprep.subr.bf16.mxu0 %v3201_v32  ;;  %594 = vmatprep.subr.bf16.mxu1 %v3203_v44  ;;  %v3191_v32 = vcombine.high %v136_v26, %v140_v27  ;;  %v148_v35 = vld [vmem:[#allocation5 + $0xf8] sm:$0xff]  ;;  %v3205_v36 = vcombine.high %v151_v29, %v155_v30  ;;  %v163_v38 = vld [vmem:[#allocation5 + $0x170] sm:$0xff]  ;;  %v3204_v41 = vcombine.low %v151_v29, %v155_v30 }
  0x82   :  { %v152_v42 = vld [vmem:[#allocation5 + $0x118] sm:$0xff]  ;;  %v167_v44 = vld [vmem:[#allocation5 + $0x190] sm:$0xff]  ;;  %v3198_v46 = vcombine.low %v144_v34, %v148_v35 }
  0x83   :  { %v156_v43 = vld [vmem:[#allocation5 + $0x138] sm:$0xff]  ;;  %v3667_v13 = vld [vmem:[#allocation8 + $0x2c] ss:$16 sps:$4 sm:$0xff]   ;;  %v3683_v27 = vld [vmem:[#allocation8 + $0x88] ss:$16 sps:$4 sm:$0xff]  }
  0x84   :  { %552 = vmatpush1.bf16.msra.mxu0 %v3200_v37  ;;  %595 = vmatpush1.bf16.msra.mxu1 %v3202_v51  ;;  %v159_v37 = vld [vmem:[#allocation5 + $0x150] sm:$0xff]  ;;  %v3207_v47 = vcombine.high %v152_v42, %v156_v43  ;;  %v160_v49 = vld [vmem:[#allocation5 + $0x158] sm:$0xff]  ;;  %v3206_v54 = vcombine.low %v152_v42, %v156_v43 }
  0x85   :  { %553 = vmatprep.subr.bf16.mxu0 %v3209_v40  ;;  %596 = vmatprep.subr.bf16.mxu1 %v3211_v52  ;;  %v3199_v40 = vcombine.high %v144_v34, %v148_v35  ;;  %v164_v50 = vld [vmem:[#allocation5 + $0x178] sm:$0xff]  ;;  %v175_v52 = vld [vmem:[#allocation5 + $0x1d0] sm:$0xff] }
  0x86   :  { %v3215_v55 = vcombine.high %v160_v49, %v164_v50  ;;  %v168_v57 = vld [vmem:[#allocation5 + $0x198] sm:$0xff]  ;;  %v3214_v60 = vcombine.low %v160_v49, %v164_v50  ;;  %v3679_v21 = vld [vmem:[#allocation8 + $0x6c] ss:$16 sps:$4 sm:$0xff]   ;;  %v3695_v35 = vld [vmem:[#allocation8 + $0xc8] ss:$16 sps:$4 sm:$0xff]  }
  0x87   :  { %v172_v58 = vld [vmem:[#allocation5 + $0x1b8] sm:$0xff]  ;;  %v3707_v43 = vld [vmem:[#allocation8 + $0x108] ss:$16 sps:$4 sm:$0xff]  }
  0x88   :  { %554 = vmatpush1.bf16.msra.mxu0 %v3208_v45  ;;  %597 = vmatpush1.bf16.msra.mxu1 %v3210_v59  ;;  %v171_v45 = vld [vmem:[#allocation5 + $0x1b0] sm:$0xff]  ;;  %v176_v61 = vld [vmem:[#allocation5 + $0x1d8] sm:$0xff] }
  0x89   :  { %555 = vmatprep.subr.bf16.mxu0 %v3217_v48  ;;  %598 = vmatprep.subr.bf16.mxu1 %v3219_v62  ;;  %v3212_v48 = vcombine.low %v159_v37, %v163_v38  ;;  %v3221_v51 = vcombine.high %v167_v44, %v171_v45  ;;  %v3223_v62 = vcombine.high %v168_v57, %v172_v58  ;;  %v3658_v1 = vld [vmem:[#allocation8 + $0x4] ss:$16 sps:$4 sm:$0xff]   ;;  %v3656_v4 = vld [vmem:[#allocation8] ss:$16 sps:$4 sm:$0xff]   ;;  %v3719_v50 = vld [vmem:[#allocation8 + $0x148] ss:$16 sps:$4 sm:$0xff]  }
  0x8a   :  { %v3664_v6 = vld [vmem:[#allocation8 + $0x24] ss:$16 sps:$4 sm:$0xff]   ;;  %v3662_v10 = vld [vmem:[#allocation8 + $0x20] ss:$16 sps:$4 sm:$0xff]  }
  0x8b   :  { %v3670_v11 = vld [vmem:[#allocation8 + $0x44] ss:$16 sps:$4 sm:$0xff]   ;;  %v3674_v18 = vld [vmem:[#allocation8 + $0x60] ss:$16 sps:$4 sm:$0xff]  }
  0x8c   :  { %556 = vmatpush1.bf16.msra.mxu0 %v3216_v53  ;;  %599 = vmatpush1.bf16.msra.mxu1 %v3218_v5  ;;  %v179_v53 = vld [vmem:[#allocation5 + $0x1f0] sm:$0xff]  ;;  %v3676_v15 = vld [vmem:[#allocation8 + $0x64] ss:$16 sps:$4 sm:$0xff]   ;;  %v3680_v22 = vld [vmem:[#allocation8 + $0x80] ss:$16 sps:$4 sm:$0xff]  }
  0x8d   :  { %557 = vmatprep.subr.bf16.mxu0 %v3225_v56  ;;  %600 = vmatprep.subr.bf16.mxu1 %v3227_v8  ;;  %v3220_v56 = vcombine.low %v167_v44, %v171_v45  ;;  %v3229_v59 = vcombine.high %v175_v52, %v179_v53  ;;  %v3228_v2 = vcombine.low %v175_v52, %v179_v53  ;;  %v3661_v8 = vld [vmem:[#allocation8 + $0xc] ss:$16 sps:$4 sm:$0xff]   ;;  %v3682_v19 = vld [vmem:[#allocation8 + $0x84] ss:$16 sps:$4 sm:$0xff]   ;;  %v3692_v29 = vld [vmem:[#allocation8 + $0xc0] ss:$16 sps:$4 sm:$0xff]  }
  0x8e   :  { %v3694_v26 = vld [vmem:[#allocation8 + $0xc4] ss:$16 sps:$4 sm:$0xff]   ;;  %v3716_v44 = vld [vmem:[#allocation8 + $0x140] ss:$16 sps:$4 sm:$0xff]  }
  0x8f   :  { %v3700_v30 = vld [vmem:[#allocation8 + $0xe4] ss:$16 sps:$4 sm:$0xff]   ;;  %v3728_v52 = vld [vmem:[#allocation8 + $0x180] ss:$16 sps:$4 sm:$0xff]  }
  0x90   :  { %558 = vmatpush1.bf16.msra.mxu0 %v3224_v63  ;;  %601 = vmatpush1.bf16.msra.mxu1 %v3226_v14  ;;  %v180_v63 = vld [vmem:[#allocation5 + $0x1f8] sm:$0xff] }
  0x91   :  { %629 = vmatprep.subr.bf16.mxu0 %v3173_v3  ;;  %672 = vmatprep.subr.bf16.mxu1 %v3175_v16  ;;  %v3222_v3 = vcombine.low %v168_v57, %v172_v58  ;;  %v3231_v5 = vcombine.high %v176_v61, %v180_v63  ;;  %v3668_v14 = vld [vmem:[#allocation8 + $0x40] ss:$16 sps:$4 sm:$0xff]   ;;  %v3665_v16 = vld [vmem:[#allocation8 + $0x28] ss:$16 sps:$4 sm:$0xff]   ;;  %v3706_v34 = vld [vmem:[#allocation8 + $0x104] ss:$16 sps:$4 sm:$0xff]  }
  0x92   :  { %v3718_v42 = vld [vmem:[#allocation8 + $0x144] ss:$16 sps:$4 sm:$0xff]   ;;  %v3731_v57 = vld [vmem:[#allocation8 + $0x188] ss:$16 sps:$4 sm:$0xff]  }
  0x93   :  { %576 = vmatmul.mubr.bf16.vlgmr.msra.gmra.mrb[0].mxu0 %v4398_v7  ;;  %619 = vmatmul.mubr.bf16.vlgmr.msra.gmra.mrb[0].mxu1 %v4398_v7  ;;  %v3724_v45 = vld [vmem:[#allocation8 + $0x164] ss:$16 sps:$4 sm:$0xff]  }
  0x94   :  { %630 = vmatpush1.bf16.msra.mxu0 %v3172_v9  ;;  %661 = vmatprep.mubr.bf16.mxu0 %v4270_v0  ;;  %v3230_v9 = vcombine.low %v176_v61, %v180_v63  ;;  %v3730_v49 = vld [vmem:[#allocation8 + $0x184] ss:$16 sps:$4 sm:$0xff]   ;;  %v3737_v61 = vld [vmem:[#allocation8 + $0x1a8] ss:$16 sps:$4 sm:$0xff]   ;;  %v3745_v63 = vld [vmem:[#allocation8 + $0x1cc] ss:$16 sps:$4 sm:$0xff]  }
  0x95   :  { %631 = vmatprep.subr.bf16.mxu0 %v3181_v12  ;;  %673 = vmatpush1.bf16.msra.mxu1 %v3174_v23  ;;  %v3659_v12 = vld [vmem:[#allocation8 + $0x8] ss:$16 sps:$4 sm:$0xff]   ;;  %v3688_v23 = vld [vmem:[#allocation8 + $0xa4] ss:$16 sps:$4 sm:$0xff]  }
  0x96   :  { %704 = vmatprep.mubr.bf16.mxu1 %v4270_v0  ;;  %674 = vmatprep.subr.bf16.mxu1 %v3183_v24  ;;  %v3213_v0 = vcombine.high %v159_v37, %v163_v38  ;;  %v3677_v24 = vld [vmem:[#allocation8 + $0x68] ss:$16 sps:$4 sm:$0xff]   ;;  %v3704_v37 = vld [vmem:[#allocation8 + $0x100] ss:$16 sps:$4 sm:$0xff]   ;;  %v3712_v38 = vld [vmem:[#allocation8 + $0x124] ss:$16 sps:$4 sm:$0xff]  }
  0x97   :  { %v3736_v53 = vld [vmem:[#allocation8 + $0x1a4] ss:$16 sps:$4 sm:$0xff]  }
  0x98   :  { %632 = vmatpush1.bf16.msra.mxu0 %v3180_v17  ;;  %v3673_v17 = vld [vmem:[#allocation8 + $0x4c] ss:$16 sps:$4 sm:$0xff]   ;;  %v3742_v58 = vld [vmem:[#allocation8 + $0x1c4] ss:$16 sps:$4 sm:$0xff]  }
  0x99   :  { %633 = vmatprep.subr.bf16.mxu0 %v3189_v20  ;;  %675 = vmatpush1.bf16.msra.mxu1 %v3182_v31  ;;  %v3671_v20 = vld [vmem:[#allocation8 + $0x48] ss:$16 sps:$4 sm:$0xff]  }
  0x9a   :  { %676 = vmatprep.subr.bf16.mxu1 %v3191_v32  ;;  %v3689_v31 = vld [vmem:[#allocation8 + $0xa8] ss:$16 sps:$4 sm:$0xff]   ;;  %v3697_v32 = vld [vmem:[#allocation8 + $0xcc] ss:$16 sps:$4 sm:$0xff]  }
  0x9c   :  { %634 = vmatpush1.bf16.msra.mxu0 %v3188_v25  ;;  %v3685_v25 = vld [vmem:[#allocation8 + $0x8c] ss:$16 sps:$4 sm:$0xff]  }
  0x9d   :  { %635 = vmatprep.subr.bf16.mxu0 %v3197_v28  ;;  %677 = vmatpush1.bf16.msra.mxu1 %v3190_v39  ;;  %v3691_v28 = vld [vmem:[#allocation8 + $0xac] ss:$16 sps:$4 sm:$0xff]   ;;  %v3701_v39 = vld [vmem:[#allocation8 + $0xe8] ss:$16 sps:$4 sm:$0xff]  }
  0x9e   :  { %678 = vmatprep.subr.bf16.mxu1 %v3199_v40  ;;  %v3709_v40 = vld [vmem:[#allocation8 + $0x10c] ss:$16 sps:$4 sm:$0xff]  }
  0xa0   :  { %636 = vmatpush1.bf16.msra.mxu0 %v3196_v33  ;;  %v3698_v33 = vld [vmem:[#allocation8 + $0xe0] ss:$16 sps:$4 sm:$0xff]  }
  0xa1   :  { %637 = vmatprep.subr.bf16.mxu0 %v3205_v36  ;;  %679 = vmatpush1.bf16.msra.mxu1 %v3198_v46  ;;  %v3703_v36 = vld [vmem:[#allocation8 + $0xec] ss:$16 sps:$4 sm:$0xff]   ;;  %v3713_v46 = vld [vmem:[#allocation8 + $0x128] ss:$16 sps:$4 sm:$0xff]  }
  0xa2   :  { %680 = vmatprep.subr.bf16.mxu1 %v3207_v47  ;;  %v3721_v47 = vld [vmem:[#allocation8 + $0x14c] ss:$16 sps:$4 sm:$0xff]  }
  0xa4   :  { %638 = vmatpush1.bf16.msra.mxu0 %v3204_v41  ;;  %v3710_v41 = vld [vmem:[#allocation8 + $0x120] ss:$16 sps:$4 sm:$0xff]  }
  0xa5   :  { %639 = vmatprep.subr.bf16.mxu0 %v3213_v0  ;;  %681 = vmatpush1.bf16.msra.mxu1 %v3206_v54  ;;  %v3715_v0 = vld [vmem:[#allocation8 + $0x12c] ss:$16 sps:$4 sm:$0xff]   ;;  %v3725_v54 = vld [vmem:[#allocation8 + $0x168] ss:$16 sps:$4 sm:$0xff]  }
  0xa6   :  { %682 = vmatprep.subr.bf16.mxu1 %v3215_v55  ;;  %v3733_v55 = vld [vmem:[#allocation8 + $0x18c] ss:$16 sps:$4 sm:$0xff]  }
  0xa8   :  { %640 = vmatpush1.bf16.msra.mxu0 %v3212_v48  ;;  %v3722_v48 = vld [vmem:[#allocation8 + $0x160] ss:$16 sps:$4 sm:$0xff]  }
  0xa9   :  { %641 = vmatprep.subr.bf16.mxu0 %v3221_v51  ;;  %683 = vmatpush1.bf16.msra.mxu1 %v3214_v60  ;;  %v3727_v51 = vld [vmem:[#allocation8 + $0x16c] ss:$16 sps:$4 sm:$0xff]   ;;  %v3740_v60 = vld [vmem:[#allocation8 + $0x1c0] ss:$16 sps:$4 sm:$0xff]  }
  0xaa   :  { %684 = vmatprep.subr.bf16.mxu1 %v3223_v62  ;;  %v3748_v62 = vld [vmem:[#allocation8 + $0x1e4] ss:$16 sps:$4 sm:$0xff]  }
  0xac   :  { %642 = vmatpush1.bf16.msra.mxu0 %v3220_v56  ;;  %v3734_v56 = vld [vmem:[#allocation8 + $0x1a0] ss:$16 sps:$4 sm:$0xff]  }
  0xad   :  { %643 = vmatprep.subr.bf16.mxu0 %v3229_v59  ;;  %685 = vmatpush1.bf16.msra.mxu1 %v3222_v3  ;;  %v3739_v59 = vld [vmem:[#allocation8 + $0x1ac] ss:$16 sps:$4 sm:$0xff]   ;;  %v3754_v3 = vld [vmem:[#allocation8 + $0x204] ss:$16 sps:$4 sm:$0xff]  }
  0xae   :  { %686 = vmatprep.subr.bf16.mxu1 %v3231_v5  ;;  %v3749_v5 = vld [vmem:[#allocation8 + $0x1e8] ss:$16 sps:$4 sm:$0xff]  }
  0xb0   :  { %644 = vmatpush1.bf16.msra.mxu0 %v3228_v2  ;;  %v3743_v2 = vld [vmem:[#allocation8 + $0x1c8] ss:$16 sps:$4 sm:$0xff]  }
  0xb1   :  { %2297 = vmatprep.subr.bf16.mxu0 %v3658_v1  ;;  %687 = vmatpush1.bf16.msra.mxu1 %v3230_v9  ;;  %v3746_v1 = vld [vmem:[#allocation8 + $0x1e0] ss:$16 sps:$4 sm:$0xff]  }
  0xb2   :  { %2469 = vmatprep.subr.bf16.mxu1 %v3661_v8  ;;  %v183_v8 = vlaneseq }
  0xb3   :  { %662 = vmatmul.mubr.bf16.vlgmr.msra.gmra.mrb[4].mxu0 %v4398_v7 }
  0xb4   :  { %2298 = vmatpush1.bf16.msra.mxu0 %v3656_v4  ;;  %705 = vmatmul.mubr.bf16.vlgmr.msra.gmra.mrb[4].mxu1 %v4398_v7  ;;  %v3686_v7 = vld [vmem:[#allocation8 + $0xa0] ss:$16 sps:$4 sm:$0xff]   ;;  %v3751_v4 = vld [vmem:[#allocation8 + $0x1ec] ss:$16 sps:$4 sm:$0xff]   ;;  %v4406_v9 = vshrl.u32 %v183_v8, 7 }
  0xb5   :  { %2299 = vmatprep.subr.bf16.mxu0 %v3664_v6  ;;  %2470 = vmatpush1.bf16.msra.mxu1 %v3659_v12  ;;  %v3757_v6 = vld [vmem:[#allocation8 + $0x20c] ss:$16 sps:$4 sm:$0xff]  }
  0xb6   :  { %2471 = vmatprep.subr.bf16.mxu1 %v3667_v13  ;;  %v189_v12 = vsub.s32 1, %v4406_v9  ;;  %v3793_v8 = vld [vmem:[#allocation8 + $0x2cc] ss:$16 sps:$4 sm:$0xff]  }
  0xb8   :  { %2300 = vmatpush1.bf16.msra.mxu0 %v3662_v10  ;;  %v185_v10 = vsub.s32 0, %v4406_v9 }
  0xb9   :  { %2301 = vmatprep.subr.bf16.mxu0 %v3670_v11  ;;  %2472 = vmatpush1.bf16.msra.mxu1 %v3665_v16  ;;  %v4409_v11 = vld [vmem:[#allocation7] sm:$0xff] }
  0xba   :  { %2473 = vmatprep.subr.bf16.mxu1 %v3673_v17  ;;  %v186_v13 = vrot.slane %v4409_v11, %v185_v10  ;;  %v197_v17 = vsub.s32 3, %v4406_v9 }
  0xbc   :  { %2302 = vmatpush1.bf16.msra.mxu0 %v3668_v14  ;;  %v190_v14 = vrot.slane %v4409_v11, %v189_v12 }
  0xbd   :  { %2303 = vmatprep.subr.bf16.mxu0 %v3676_v15  ;;  %2474 = vmatpush1.bf16.msra.mxu1 %v3671_v20  ;;  %v193_v15 = vsub.s32 2, %v4406_v9 }
  0xbe   :  { %2475 = vmatprep.subr.bf16.mxu1 %v3679_v21 }
  0xc0   :  { %2304 = vmatpush1.bf16.msra.mxu0 %v3674_v18 }
  0xc1   :  { %2305 = vmatprep.subr.bf16.mxu0 %v3682_v19  ;;  %2476 = vmatpush1.bf16.msra.mxu1 %v3677_v24  ;;  %v194_v24 = vrot.slane %v4409_v11, %v193_v15 }
  0xc2   :  { %2477 = vmatprep.subr.bf16.mxu1 %v3685_v25 }
  0xc4   :  { %2306 = vmatpush1.bf16.msra.mxu0 %v3680_v22 }
  0xc5   :  { %2307 = vmatprep.subr.bf16.mxu0 %v3688_v23  ;;  %2478 = vmatpush1.bf16.msra.mxu1 %v3683_v27 }
  0xc6   :  { %2479 = vmatprep.subr.bf16.mxu1 %v3691_v28 }
  0xc8   :  { %2308 = vmatpush1.bf16.msra.mxu0 %v3686_v7  ;;  %v198_v7 = vrot.slane %v4409_v11, %v197_v17 }
  0xc9   :  { %2309 = vmatprep.subr.bf16.mxu0 %v3694_v26  ;;  %2480 = vmatpush1.bf16.msra.mxu1 %v3689_v31 }
  0xca   :  { %2481 = vmatprep.subr.bf16.mxu1 %v3697_v32 }
  0xcc   :  { %2310 = vmatpush1.bf16.msra.mxu0 %v3692_v29 }
  0xcd   :  { %2311 = vmatprep.subr.bf16.mxu0 %v3700_v30  ;;  %2482 = vmatpush1.bf16.msra.mxu1 %v3695_v35  ;;  %v3752_v35 = vld [vmem:[#allocation8 + $0x200] ss:$16 sps:$4 sm:$0xff]  }
  0xce   :  { %2483 = vmatprep.subr.bf16.mxu1 %v3703_v36  ;;  %v3755_v36 = vld [vmem:[#allocation8 + $0x208] ss:$16 sps:$4 sm:$0xff]  }
  0xd0   :  { %2312 = vmatpush1.bf16.msra.mxu0 %v3698_v33 }
  0xd1   :  { %2313 = vmatprep.subr.bf16.mxu0 %v3706_v34  ;;  %2484 = vmatpush1.bf16.msra.mxu1 %v3701_v39  ;;  %v3760_v39 = vld [vmem:[#allocation8 + $0x224] ss:$16 sps:$4 sm:$0xff]  }
  0xd2   :  { %2485 = vmatprep.subr.bf16.mxu1 %v3709_v40  ;;  %v3763_v40 = vld [vmem:[#allocation8 + $0x22c] ss:$16 sps:$4 sm:$0xff]  }
  0xd4   :  { %2314 = vmatpush1.bf16.msra.mxu0 %v3704_v37 }
  0xd5   :  { %2315 = vmatprep.subr.bf16.mxu0 %v3712_v38  ;;  %2486 = vmatpush1.bf16.msra.mxu1 %v3707_v43 }
  0xd6   :  { %2487 = vmatprep.subr.bf16.mxu1 %v3715_v0 }
  0xd8   :  { %2316 = vmatpush1.bf16.msra.mxu0 %v3710_v41 }
  0xd9   :  { %2317 = vmatprep.subr.bf16.mxu0 %v3718_v42  ;;  %2488 = vmatpush1.bf16.msra.mxu1 %v3713_v46  ;;  %v3758_v46 = vld [vmem:[#allocation8 + $0x220] ss:$16 sps:$4 sm:$0xff]  }
  0xda   :  { %2489 = vmatprep.subr.bf16.mxu1 %v3721_v47  ;;  %v3761_v47 = vld [vmem:[#allocation8 + $0x228] ss:$16 sps:$4 sm:$0xff]  }
  0xdc   :  { %2318 = vmatpush1.bf16.msra.mxu0 %v3716_v44 }
  0xdd   :  { %2319 = vmatprep.subr.bf16.mxu0 %v3724_v45  ;;  %2490 = vmatpush1.bf16.msra.mxu1 %v3719_v50  ;;  %v3769_v50 = vld [vmem:[#allocation8 + $0x24c] ss:$16 sps:$4 sm:$0xff]  }
  0xde   :  { %2491 = vmatprep.subr.bf16.mxu1 %v3727_v51 }
  0xe0   :  { %2320 = vmatpush1.bf16.msra.mxu0 %v3722_v48 }
  0xe1   :  { %2321 = vmatprep.subr.bf16.mxu0 %v3730_v49  ;;  %2492 = vmatpush1.bf16.msra.mxu1 %v3725_v54  ;;  %v3766_v49 = vld [vmem:[#allocation8 + $0x244] ss:$16 sps:$4 sm:$0xff]   ;;  %v3767_v54 = vld [vmem:[#allocation8 + $0x248] ss:$16 sps:$4 sm:$0xff]  }
  0xe2   :  { %2493 = vmatprep.subr.bf16.mxu1 %v3733_v55  ;;  %v3772_v55 = vld [vmem:[#allocation8 + $0x264] ss:$16 sps:$4 sm:$0xff]  }
  0xe4   :  { %2322 = vmatpush1.bf16.msra.mxu0 %v3728_v52 }
  0xe5   :  { %2323 = vmatprep.subr.bf16.mxu0 %v3736_v53  ;;  %2494 = vmatpush1.bf16.msra.mxu1 %v3731_v57  ;;  %v3764_v53 = vld [vmem:[#allocation8 + $0x240] ss:$16 sps:$4 sm:$0xff]  }
  0xe6   :  { %2495 = vmatprep.subr.bf16.mxu1 %v3739_v59  ;;  %v3770_v57 = vld [vmem:[#allocation8 + $0x260] ss:$16 sps:$4 sm:$0xff]   ;;  %v3778_v59 = vld [vmem:[#allocation8 + $0x284] ss:$16 sps:$4 sm:$0xff]  }
  0xe8   :  { %2324 = vmatpush1.bf16.msra.mxu0 %v3734_v56  ;;  %v3775_v56 = vld [vmem:[#allocation8 + $0x26c] ss:$16 sps:$4 sm:$0xff]  }
  0xe9   :  { %2325 = vmatprep.subr.bf16.mxu0 %v3742_v58  ;;  %2496 = vmatpush1.bf16.msra.mxu1 %v3737_v61  ;;  %v3773_v58 = vld [vmem:[#allocation8 + $0x268] ss:$16 sps:$4 sm:$0xff]   ;;  %v3776_v61 = vld [vmem:[#allocation8 + $0x280] ss:$16 sps:$4 sm:$0xff]  }
  0xea   :  { %2497 = vmatprep.subr.bf16.mxu1 %v3745_v63  ;;  %v3784_v63 = vld [vmem:[#allocation8 + $0x2a4] ss:$16 sps:$4 sm:$0xff]  }
  0xec   :  { %2326 = vmatpush1.bf16.msra.mxu0 %v3740_v60  ;;  %v3781_v60 = vld [vmem:[#allocation8 + $0x28c] ss:$16 sps:$4 sm:$0xff]  }
  0xed   :  { %2327 = vmatprep.subr.bf16.mxu0 %v3748_v62  ;;  %2498 = vmatpush1.bf16.msra.mxu1 %v3743_v2  ;;  %v3779_v62 = vld [vmem:[#allocation8 + $0x288] ss:$16 sps:$4 sm:$0xff]   ;;  %v201_v2 = vsub.s32 4, %v4406_v9 }
  0xee   :  { %2499 = vmatprep.subr.bf16.mxu1 %v3751_v4  ;;  %v3782_v4 = vld [vmem:[#allocation8 + $0x2a0] ss:$16 sps:$4 sm:$0xff]  }
  0xf0   :  { %2328 = vmatpush1.bf16.msra.mxu0 %v3746_v1  ;;  %v3787_v1 = vld [vmem:[#allocation8 + $0x2ac] ss:$16 sps:$4 sm:$0xff]  }
  0xf1   :  { %2340 = vmatprep.subr.bf16.mxu0 %v3754_v3  ;;  %2500 = vmatpush1.bf16.msra.mxu1 %v3749_v5  ;;  %v205_v3 = vsub.s32 5, %v4406_v9  ;;  %v3785_v5 = vld [vmem:[#allocation8 + $0x2a8] ss:$16 sps:$4 sm:$0xff]  }
  0xf2   :  { %2512 = vmatprep.subr.bf16.mxu1 %v3757_v6  ;;  %v3790_v6 = vld [vmem:[#allocation8 + $0x2c4] ss:$16 sps:$4 sm:$0xff]  }
 0x166   :  { %v577_v16 = vpop.f32.mrb[0].mxu0  ;;  %v620_v30 = vpop.f32.mrb[0].mxu1 }
 0x167   :  { %v578_v18 = vadd.f32 %v577_v16, %v186_v13  ;;  %v579_v19 = vpop.f32.mrb[1].mxu0  ;;  %v621_v32 = vadd.f32 %v620_v30, %v194_v24  ;;  %v622_v33 = vpop.f32.mrb[1].mxu1  ;;  %v209_v16 = vsub.s32 6, %v4406_v9 }
 0x168   :  { %v580_v20 = vadd.f32 %v579_v19, %v190_v14  ;;  %v581_v21 = vpop.f32.mrb[2].mxu0  ;;  %v623_v37 = vadd.f32 %v622_v33, %v198_v7  ;;  %v624_v38 = vpop.f32.mrb[2].mxu1  ;;  %v3791_v19 = vld [vmem:[#allocation8 + $0x2c8] ss:$16 sps:$4 sm:$0xff]  }
 0x169   :  { %v582_v22 = vadd.f32 %v581_v21, %v186_v13  ;;  %v583_v23 = vpop.f32.mrb[3].mxu0  ;;  %v715_v26 = vmax.f32 %v578_v18, 0.0  ;;  %v717_v41 = vmax.f32 %v621_v32, 0.0  ;;  %v625_v42 = vadd.f32 %v624_v38, %v194_v24  ;;  %v626_v43 = vpop.f32.mrb[3].mxu1  ;;  %v3788_v18 = vld [vmem:[#allocation8 + $0x2c0] ss:$16 sps:$4 sm:$0xff]  }
 0x16a   :  { %v584_v25 = vadd.f32 %v583_v23, %v190_v14  ;;  %v716_v28 = vmax.f32 %v580_v20, 0.0  ;;  %v718_v0 = vmax.f32 %v623_v37, 0.0  ;;  %v627_v44 = vadd.f32 %v626_v43, %v198_v7  ;;  %v3799_v23 = vld [vmem:[#allocation8 + $0x2ec] ss:$16 sps:$4 sm:$0xff]   ;;  %v3797_v32 = vld [vmem:[#allocation8 + $0x2e8] ss:$16 sps:$4 sm:$0xff]  }
 0x16b   :  { %v723_v27 = vmax.f32 %v582_v22, 0.0  ;;  %v725_v45 = vmax.f32 %v625_v42, 0.0  ;;  %v202_v13 = vrot.slane %v4409_v11, %v201_v2  ;;  %v206_v14 = vrot.slane %v4409_v11, %v205_v3  ;;  %v3796_v22 = vld [vmem:[#allocation8 + $0x2e4] ss:$16 sps:$4 sm:$0xff]   ;;  %v3805_v37 = vld [vmem:[#allocation8 + $0x30c] ss:$16 sps:$4 sm:$0xff]  }
 0x16c   :  { %v724_v29 = vmax.f32 %v584_v25, 0.0  ;;  %v726_v48 = vmax.f32 %v627_v44, 0.0  ;;  %v213_v21 = vsub.s32 7, %v4406_v9  ;;  %v210_v30 = vrot.slane %v4409_v11, %v209_v16  ;;  %v3803_v44 = vld [vmem:[#allocation8 + $0x308] ss:$16 sps:$4 sm:$0xff]  }
 0x16d   :  { %v731_v31 = vpack.c.bf16 %v723_v27, %v715_v26  ;;  %v4426_v51 = vpack.c.bf16 %v725_v45, %v717_v41  ;;  %v3820_v2 = vld [vmem:[#allocation8 + $0x364] ss:$16 sps:$4 sm:$0xff]   ;;  %v3823_v3 = vld [vmem:[#allocation8 + $0x36c] ss:$16 sps:$4 sm:$0xff]  }
 0x16e   :  { %v732_v34 = vpack.c.bf16 %v724_v29, %v716_v28  ;;  %v734_v52 = vpack.c.bf16 %v726_v48, %v718_v0  ;;  %v3800_v0 = vld [vmem:[#allocation8 + $0x300] ss:$16 sps:$4 sm:$0xff]   ;;  %v3811_v48 = vld [vmem:[#allocation8 + $0x32c] ss:$16 sps:$4 sm:$0xff]   ;;  %v3832_v16 = vld [vmem:[#allocation8 + $0x3a4] ss:$16 sps:$4 sm:$0xff]  }
 0x170   :  { %2329 = vmatprep.mubr.bf16.mxu0 %v732_v34  ;;  %2501 = vmatprep.mubr.bf16.mxu1 %v732_v34 }
 0x171   :  { %2330 = vmatmul.mubr.bf16.vlgmr.msra.gmra.mrb[8].mxu0 %v731_v31  ;;  %2502 = vmatmul.mubr.bf16.vlgmr.msra.gmra.mrb[8].mxu1 %v731_v31  ;;  %v3794_v31 = vld [vmem:[#allocation8 + $0x2e0] ss:$16 sps:$4 sm:$0xff]  }
 0x172   :  { %2341 = vmatpush1.bf16.msra.mxu0 %v3752_v35  ;;  %2513 = vmatpush1.bf16.msra.mxu1 %v3755_v36  ;;  %v214_v35 = vrot.slane %v4409_v11, %v213_v21  ;;  %v3802_v36 = vld [vmem:[#allocation8 + $0x304] ss:$16 sps:$4 sm:$0xff]  }
 0x173   :  { %2342 = vmatprep.subr.bf16.mxu0 %v3760_v39  ;;  %2514 = vmatprep.subr.bf16.mxu1 %v3763_v40  ;;  %v3808_v11 = vld [vmem:[#allocation8 + $0x324] ss:$16 sps:$4 sm:$0xff]  }
 0x174   :  { %2372 = vmatprep.mubr.bf16.mxu0 %v734_v52  ;;  %2544 = vmatprep.mubr.bf16.mxu1 %v734_v52  ;;  %v3838_v21 = vld [vmem:[#allocation8 + $0x3c4] ss:$16 sps:$4 sm:$0xff]  }
 0x176   :  { %2343 = vmatpush1.bf16.msra.mxu0 %v3758_v46  ;;  %2515 = vmatpush1.bf16.msra.mxu1 %v3761_v47 }
 0x177   :  { %2344 = vmatprep.subr.bf16.mxu0 %v3766_v49  ;;  %2516 = vmatprep.subr.bf16.mxu1 %v3769_v50 }
 0x17a   :  { %2345 = vmatpush1.bf16.msra.mxu0 %v3764_v53  ;;  %2517 = vmatpush1.bf16.msra.mxu1 %v3767_v54 }
 0x17b   :  { %2346 = vmatprep.subr.bf16.mxu0 %v3772_v55  ;;  %2518 = vmatprep.subr.bf16.mxu1 %v3775_v56  ;;  %v3806_v56 = vld [vmem:[#allocation8 + $0x320] ss:$16 sps:$4 sm:$0xff]  }
 0x17e   :  { %2347 = vmatpush1.bf16.msra.mxu0 %v3770_v57  ;;  %2519 = vmatpush1.bf16.msra.mxu1 %v3773_v58  ;;  %v3809_v57 = vld [vmem:[#allocation8 + $0x328] ss:$16 sps:$4 sm:$0xff]  }
 0x17f   :  { %2348 = vmatprep.subr.bf16.mxu0 %v3778_v59  ;;  %2520 = vmatprep.subr.bf16.mxu1 %v3781_v60  ;;  %v3814_v59 = vld [vmem:[#allocation8 + $0x344] ss:$16 sps:$4 sm:$0xff]   ;;  %v3817_v60 = vld [vmem:[#allocation8 + $0x34c] ss:$16 sps:$4 sm:$0xff]  }
 0x182   :  { %2349 = vmatpush1.bf16.msra.mxu0 %v3776_v61  ;;  %2521 = vmatpush1.bf16.msra.mxu1 %v3779_v62 }
 0x183   :  { %2350 = vmatprep.subr.bf16.mxu0 %v3784_v63  ;;  %2522 = vmatprep.subr.bf16.mxu1 %v3787_v1  ;;  %v3812_v63 = vld [vmem:[#allocation8 + $0x340] ss:$16 sps:$4 sm:$0xff]   ;;  %v3815_v1 = vld [vmem:[#allocation8 + $0x348] ss:$16 sps:$4 sm:$0xff]  }
 0x186   :  { %2351 = vmatpush1.bf16.msra.mxu0 %v3782_v4  ;;  %2523 = vmatpush1.bf16.msra.mxu1 %v3785_v5  ;;  %v663_v20 = vpop.f32.mrb[4].mxu0  ;;  %v3818_v4 = vld [vmem:[#allocation8 + $0x360] ss:$16 sps:$4 sm:$0xff]   ;;  %v3821_v5 = vld [vmem:[#allocation8 + $0x368] ss:$16 sps:$4 sm:$0xff]  }
 0x187   :  { %2352 = vmatprep.subr.bf16.mxu0 %v3790_v6  ;;  %2524 = vmatprep.subr.bf16.mxu1 %v3793_v8  ;;  %v664_v24 = vadd.f32 %v663_v20, %v202_v13  ;;  %v665_v25 = vpop.f32.mrb[5].mxu0  ;;  %v706_v40 = vpop.f32.mrb[4].mxu1  ;;  %v3826_v6 = vld [vmem:[#allocation8 + $0x384] ss:$16 sps:$4 sm:$0xff]   ;;  %v3829_v8 = vld [vmem:[#allocation8 + $0x38c] ss:$16 sps:$4 sm:$0xff]  }
 0x188   :  { %v666_v7 = vadd.f32 %v665_v25, %v206_v14  ;;  %v667_v26 = vpop.f32.mrb[6].mxu0  ;;  %v707_v42 = vadd.f32 %v706_v40, %v210_v30  ;;  %v708_v43 = vpop.f32.mrb[5].mxu1  ;;  %v3833_v20 = vld [vmem:[#allocation8 + $0x3a8] ss:$16 sps:$4 sm:$0xff]   ;;  %v3844_v25 = vld [vmem:[#allocation8 + $0x3e4] ss:$16 sps:$4 sm:$0xff]  }
 0x189   :  { %v719_v27 = vmax.f32 %v664_v24, 0.0  ;;  %v668_v28 = vadd.f32 %v667_v26, %v202_v13  ;;  %v669_v29 = vpop.f32.mrb[7].mxu0  ;;  %v709_v46 = vadd.f32 %v708_v43, %v214_v35  ;;  %v710_v47 = vpop.f32.mrb[6].mxu1  ;;  %v3824_v13 = vld [vmem:[#allocation8 + $0x380] ss:$16 sps:$4 sm:$0xff]  }
 0x18a   :  { %2353 = vmatpush1.bf16.msra.mxu0 %v3788_v18  ;;  %2525 = vmatpush1.bf16.msra.mxu1 %v3791_v19  ;;  %v720_v33 = vmax.f32 %v666_v7, 0.0  ;;  %v670_v34 = vadd.f32 %v669_v29, %v206_v14  ;;  %v721_v49 = vmax.f32 %v707_v42, 0.0  ;;  %v711_v50 = vadd.f32 %v710_v47, %v210_v30  ;;  %v712_v52 = vpop.f32.mrb[7].mxu1  ;;  %v3827_v14 = vld [vmem:[#allocation8 + $0x388] ss:$16 sps:$4 sm:$0xff]  }
 0x18b   :  { %2354 = vmatprep.subr.bf16.mxu0 %v3796_v22  ;;  %2526 = vmatprep.subr.bf16.mxu1 %v3799_v23  ;;  %v727_v38 = vmax.f32 %v668_v28, 0.0  ;;  %v722_v53 = vmax.f32 %v709_v46, 0.0  ;;  %v713_v54 = vadd.f32 %v712_v52, %v214_v35  ;;  %v3835_v18 = vld [vmem:[#allocation8 + $0x3ac] ss:$16 sps:$4 sm:$0xff]   ;;  %v3830_v19 = vld [vmem:[#allocation8 + $0x3a0] ss:$16 sps:$4 sm:$0xff]  }
 0x18c   :  { %v728_v39 = vmax.f32 %v670_v34, 0.0  ;;  %v729_v55 = vmax.f32 %v711_v50, 0.0  ;;  %v3841_v22 = vld [vmem:[#allocation8 + $0x3cc] ss:$16 sps:$4 sm:$0xff]   ;;  %v3836_v23 = vld [vmem:[#allocation8 + $0x3c0] ss:$16 sps:$4 sm:$0xff]  }
 0x18d   :  { %v4436_v41 = vpack.c.bf16 %v727_v38, %v719_v27  ;;  %v730_v58 = vmax.f32 %v713_v54, 0.0  ;;  %v3839_v24 = vld [vmem:[#allocation8 + $0x3c8] ss:$16 sps:$4 sm:$0xff]   ;;  %v3847_v7 = vld [vmem:[#allocation8 + $0x3ec] ss:$16 sps:$4 sm:$0xff]  }
 0x18e   :  { %2355 = vmatpush1.bf16.msra.mxu0 %v3794_v31  ;;  %2527 = vmatpush1.bf16.msra.mxu1 %v3797_v32  ;;  %v4438_v45 = vpack.c.bf16 %v728_v39, %v720_v33  ;;  %v4440_v61 = vpack.c.bf16 %v729_v55, %v721_v49  ;;  %v3842_v26 = vld [vmem:[#allocation8 + $0x3e0] ss:$16 sps:$4 sm:$0xff]   ;;  %v3845_v27 = vld [vmem:[#allocation8 + $0x3e8] ss:$16 sps:$4 sm:$0xff]   ;;  %v3850_v28 = vld [vmem:[#allocation8 + $0x404] ss:$16 sps:$4 sm:$0xff]  }
 0x18f   :  { %2356 = vmatprep.subr.bf16.mxu0 %v3802_v36  ;;  %2528 = vmatprep.subr.bf16.mxu1 %v3805_v37  ;;  %v4442_v62 = vpack.c.bf16 %v730_v58, %v722_v53  ;;  %v3853_v29 = vld [vmem:[#allocation8 + $0x40c] ss:$16 sps:$4 sm:$0xff]   ;;  %v3848_v30 = vld [vmem:[#allocation8 + $0x400] ss:$16 sps:$4 sm:$0xff]   ;;  %v3851_v31 = vld [vmem:[#allocation8 + $0x408] ss:$16 sps:$4 sm:$0xff]  }
 0x190   :  { %v3856_v32 = vld [vmem:[#allocation8 + $0x424] ss:$16 sps:$4 sm:$0xff]   ;;  %v3859_v33 = vld [vmem:[#allocation8 + $0x42c] ss:$16 sps:$4 sm:$0xff]   ;;  %v3854_v34 = vld [vmem:[#allocation8 + $0x420] ss:$16 sps:$4 sm:$0xff]  }
 0x191   :  { %v3857_v35 = vld [vmem:[#allocation8 + $0x428] ss:$16 sps:$4 sm:$0xff]   ;;  %v3862_v36 = vld [vmem:[#allocation8 + $0x444] ss:$16 sps:$4 sm:$0xff]   ;;  %v3865_v37 = vld [vmem:[#allocation8 + $0x44c] ss:$16 sps:$4 sm:$0xff]  }
 0x192   :  { %2357 = vmatpush1.bf16.msra.mxu0 %v3800_v0  ;;  %2529 = vmatpush1.bf16.msra.mxu1 %v3803_v44  ;;  %v3860_v38 = vld [vmem:[#allocation8 + $0x440] ss:$16 sps:$4 sm:$0xff]   ;;  %v3863_v39 = vld [vmem:[#allocation8 + $0x448] ss:$16 sps:$4 sm:$0xff]   ;;  %v3868_v40 = vld [vmem:[#allocation8 + $0x464] ss:$16 sps:$4 sm:$0xff]  }
 0x193   :  { %2358 = vmatprep.subr.bf16.mxu0 %v3808_v11  ;;  %2530 = vmatprep.subr.bf16.mxu1 %v3811_v48  ;;  %v3866_v42 = vld [vmem:[#allocation8 + $0x460] ss:$16 sps:$4 sm:$0xff]   ;;  %v3869_v43 = vld [vmem:[#allocation8 + $0x468] ss:$16 sps:$4 sm:$0xff]   ;;  %v3874_v0 = vld [vmem:[#allocation8 + $0x484] ss:$16 sps:$4 sm:$0xff]  }
 0x194   :  { %v3877_v44 = vld [vmem:[#allocation8 + $0x48c] ss:$16 sps:$4 sm:$0xff]   ;;  %v3872_v46 = vld [vmem:[#allocation8 + $0x480] ss:$16 sps:$4 sm:$0xff]   ;;  %v3880_v47 = vld [vmem:[#allocation8 + $0x4a4] ss:$16 sps:$4 sm:$0xff]  }
 0x195   :  { %v3883_v11 = vld [vmem:[#allocation8 + $0x4ac] ss:$16 sps:$4 sm:$0xff]   ;;  %v3878_v48 = vld [vmem:[#allocation8 + $0x4a0] ss:$16 sps:$4 sm:$0xff]   ;;  %v3881_v49 = vld [vmem:[#allocation8 + $0x4a8] ss:$16 sps:$4 sm:$0xff]  }
 0x196   :  { %2359 = vmatpush1.bf16.msra.mxu0 %v3806_v56  ;;  %2531 = vmatpush1.bf16.msra.mxu1 %v3809_v57  ;;  %v3886_v50 = vld [vmem:[#allocation8 + $0x4c4] ss:$16 sps:$4 sm:$0xff]   ;;  %v3889_v52 = vld [vmem:[#allocation8 + $0x4cc] ss:$16 sps:$4 sm:$0xff]   ;;  %v3884_v53 = vld [vmem:[#allocation8 + $0x4c0] ss:$16 sps:$4 sm:$0xff]  }
 0x197   :  { %2360 = vmatprep.subr.bf16.mxu0 %v3814_v59  ;;  %2532 = vmatprep.subr.bf16.mxu1 %v3817_v60  ;;  %v3887_v54 = vld [vmem:[#allocation8 + $0x4c8] ss:$16 sps:$4 sm:$0xff]   ;;  %v3892_v55 = vld [vmem:[#allocation8 + $0x4e4] ss:$16 sps:$4 sm:$0xff]   ;;  %v3895_v56 = vld [vmem:[#allocation8 + $0x4ec] ss:$16 sps:$4 sm:$0xff]  }
 0x198   :  { %v3890_v57 = vld [vmem:[#allocation8 + $0x4e0] ss:$16 sps:$4 sm:$0xff]   ;;  %v3893_v58 = vld [vmem:[#allocation8 + $0x4e8] ss:$16 sps:$4 sm:$0xff]   ;;  %v3898_v59 = vld [vmem:[#allocation8 + $0x504] ss:$16 sps:$4 sm:$0xff]  }
 0x199   :  { %v3901_v60 = vld [vmem:[#allocation8 + $0x50c] ss:$16 sps:$4 sm:$0xff]  }
 0x19a   :  { %2361 = vmatpush1.bf16.msra.mxu0 %v3812_v63  ;;  %2533 = vmatpush1.bf16.msra.mxu1 %v3815_v1  ;;  %v3896_v63 = vld [vmem:[#allocation8 + $0x500] ss:$16 sps:$4 sm:$0xff]   ;;  %v3899_v1 = vld [vmem:[#allocation8 + $0x508] ss:$16 sps:$4 sm:$0xff]  }
 0x19b   :  { %2362 = vmatprep.subr.bf16.mxu0 %v3820_v2  ;;  %2534 = vmatprep.subr.bf16.mxu1 %v3823_v3  ;;  %v3904_v2 = vld [vmem:[#allocation8 + $0x524] ss:$16 sps:$4 sm:$0xff]   ;;  %v3907_v3 = vld [vmem:[#allocation8 + $0x52c] ss:$16 sps:$4 sm:$0xff]  }
 0x19e   :  { %2363 = vmatpush1.bf16.msra.mxu0 %v3818_v4  ;;  %2535 = vmatpush1.bf16.msra.mxu1 %v3821_v5  ;;  %v3902_v4 = vld [vmem:[#allocation8 + $0x520] ss:$16 sps:$4 sm:$0xff]   ;;  %v3905_v5 = vld [vmem:[#allocation8 + $0x528] ss:$16 sps:$4 sm:$0xff]  }
 0x19f   :  { %2364 = vmatprep.subr.bf16.mxu0 %v3826_v6  ;;  %2536 = vmatprep.subr.bf16.mxu1 %v3829_v8  ;;  %v3910_v6 = vld [vmem:[#allocation8 + $0x544] ss:$16 sps:$4 sm:$0xff]   ;;  %v3913_v8 = vld [vmem:[#allocation8 + $0x54c] ss:$16 sps:$4 sm:$0xff]  }
 0x1a2   :  { %2365 = vmatpush1.bf16.msra.mxu0 %v3824_v13  ;;  %2537 = vmatpush1.bf16.msra.mxu1 %v3827_v14  ;;  %v3908_v13 = vld [vmem:[#allocation8 + $0x540] ss:$16 sps:$4 sm:$0xff]   ;;  %v3911_v14 = vld [vmem:[#allocation8 + $0x548] ss:$16 sps:$4 sm:$0xff]  }
 0x1a3   :  { %2366 = vmatprep.subr.bf16.mxu0 %v3832_v16  ;;  %2538 = vmatprep.subr.bf16.mxu1 %v3835_v18  ;;  %v3916_v16 = vld [vmem:[#allocation8 + $0x564] ss:$16 sps:$4 sm:$0xff]   ;;  %v3919_v18 = vld [vmem:[#allocation8 + $0x56c] ss:$16 sps:$4 sm:$0xff]  }
 0x1a6   :  { %2367 = vmatpush1.bf16.msra.mxu0 %v3830_v19  ;;  %2539 = vmatpush1.bf16.msra.mxu1 %v3833_v20  ;;  %v3914_v19 = vld [vmem:[#allocation8 + $0x560] ss:$16 sps:$4 sm:$0xff]   ;;  %v3917_v20 = vld [vmem:[#allocation8 + $0x568] ss:$16 sps:$4 sm:$0xff]  }
 0x1a7   :  { %2368 = vmatprep.subr.bf16.mxu0 %v3838_v21  ;;  %2540 = vmatprep.subr.bf16.mxu1 %v3841_v22  ;;  %v3922_v21 = vld [vmem:[#allocation8 + $0x584] ss:$16 sps:$4 sm:$0xff]   ;;  %v3925_v22 = vld [vmem:[#allocation8 + $0x58c] ss:$16 sps:$4 sm:$0xff]  }
 0x1aa   :  { %2369 = vmatpush1.bf16.msra.mxu0 %v3836_v23  ;;  %2541 = vmatpush1.bf16.msra.mxu1 %v3839_v24  ;;  %v3920_v23 = vld [vmem:[#allocation8 + $0x580] ss:$16 sps:$4 sm:$0xff]   ;;  %v3923_v24 = vld [vmem:[#allocation8 + $0x588] ss:$16 sps:$4 sm:$0xff]  }
 0x1ab   :  { %2370 = vmatprep.subr.bf16.mxu0 %v3844_v25  ;;  %2542 = vmatprep.subr.bf16.mxu1 %v3847_v7  ;;  %v3928_v25 = vld [vmem:[#allocation8 + $0x5a4] ss:$16 sps:$4 sm:$0xff]   ;;  %v3931_v7 = vld [vmem:[#allocation8 + $0x5ac] ss:$16 sps:$4 sm:$0xff]  }
 0x1ae   :  { %2371 = vmatpush1.bf16.msra.mxu0 %v3842_v26  ;;  %2543 = vmatpush1.bf16.msra.mxu1 %v3845_v27  ;;  %v3926_v26 = vld [vmem:[#allocation8 + $0x5a0] ss:$16 sps:$4 sm:$0xff]   ;;  %v3929_v27 = vld [vmem:[#allocation8 + $0x5a8] ss:$16 sps:$4 sm:$0xff]  }
 0x1af   :  { %2383 = vmatprep.subr.bf16.mxu0 %v3850_v28  ;;  %2555 = vmatprep.subr.bf16.mxu1 %v3853_v29  ;;  %v3934_v28 = vld [vmem:[#allocation8 + $0x5c4] ss:$16 sps:$4 sm:$0xff]   ;;  %v3937_v29 = vld [vmem:[#allocation8 + $0x5cc] ss:$16 sps:$4 sm:$0xff]  }
 0x1b1   :  { %2373 = vmatmul.mubr.bf16.vlgmr.msra.gmra.mrb[8].mxu0 %v4426_v51  ;;  %2545 = vmatmul.mubr.bf16.vlgmr.msra.gmra.mrb[8].mxu1 %v4426_v51  ;;  %v3871_v51 = vld [vmem:[#allocation8 + $0x46c] ss:$16 sps:$4 sm:$0xff]  }
 0x1b2   :  { %2384 = vmatpush1.bf16.msra.mxu0 %v3848_v30  ;;  %2556 = vmatpush1.bf16.msra.mxu1 %v3851_v31  ;;  %v3932_v30 = vld [vmem:[#allocation8 + $0x5c0] ss:$16 sps:$4 sm:$0xff]   ;;  %v3935_v31 = vld [vmem:[#allocation8 + $0x5c8] ss:$16 sps:$4 sm:$0xff]  }
 0x1b3   :  { %2385 = vmatprep.subr.bf16.mxu0 %v3856_v32  ;;  %2557 = vmatprep.subr.bf16.mxu1 %v3859_v33  ;;  %v3940_v32 = vld [vmem:[#allocation8 + $0x5e4] ss:$16 sps:$4 sm:$0xff]   ;;  %v3943_v33 = vld [vmem:[#allocation8 + $0x5ec] ss:$16 sps:$4 sm:$0xff]  }
 0x1b4   :  { %2415 = vmatprep.mubr.bf16.mxu0 %v4438_v45  ;;  %2587 = vmatprep.mubr.bf16.mxu1 %v4438_v45  ;;  %v3875_v45 = vld [vmem:[#allocation8 + $0x488] ss:$16 sps:$4 sm:$0xff]  }
 0x1b6   :  { %2386 = vmatpush1.bf16.msra.mxu0 %v3854_v34  ;;  %2558 = vmatpush1.bf16.msra.mxu1 %v3857_v35  ;;  %v3938_v34 = vld [vmem:[#allocation8 + $0x5e0] ss:$16 sps:$4 sm:$0xff]   ;;  %v3941_v35 = vld [vmem:[#allocation8 + $0x5e8] ss:$16 sps:$4 sm:$0xff]  }
 0x1b7   :  { %2387 = vmatprep.subr.bf16.mxu0 %v3862_v36  ;;  %2559 = vmatprep.subr.bf16.mxu1 %v3865_v37  ;;  %v3946_v36 = vld [vmem:[#allocation8 + $0x604] ss:$16 sps:$4 sm:$0xff]   ;;  %v3949_v37 = vld [vmem:[#allocation8 + $0x60c] ss:$16 sps:$4 sm:$0xff]  }
 0x1ba   :  { %2388 = vmatpush1.bf16.msra.mxu0 %v3860_v38  ;;  %2560 = vmatpush1.bf16.msra.mxu1 %v3863_v39  ;;  %v3944_v38 = vld [vmem:[#allocation8 + $0x600] ss:$16 sps:$4 sm:$0xff]   ;;  %v3947_v39 = vld [vmem:[#allocation8 + $0x608] ss:$16 sps:$4 sm:$0xff]  }
 0x1bb   :  { %2389 = vmatprep.subr.bf16.mxu0 %v3868_v40  ;;  %2561 = vmatprep.subr.bf16.mxu1 %v3871_v51  ;;  %v3952_v40 = vld [vmem:[#allocation8 + $0x624] ss:$16 sps:$4 sm:$0xff]   ;;  %v3955_v51 = vld [vmem:[#allocation8 + $0x62c] ss:$16 sps:$4 sm:$0xff]  }
 0x1be   :  { %2390 = vmatpush1.bf16.msra.mxu0 %v3866_v42  ;;  %2562 = vmatpush1.bf16.msra.mxu1 %v3869_v43  ;;  %v3950_v42 = vld [vmem:[#allocation8 + $0x620] ss:$16 sps:$4 sm:$0xff]   ;;  %v3953_v43 = vld [vmem:[#allocation8 + $0x628] ss:$16 sps:$4 sm:$0xff]  }
 0x1bf   :  { %2391 = vmatprep.subr.bf16.mxu0 %v3874_v0  ;;  %2563 = vmatprep.subr.bf16.mxu1 %v3877_v44  ;;  %v3958_v0 = vld [vmem:[#allocation8 + $0x644] ss:$16 sps:$4 sm:$0xff]   ;;  %v3961_v44 = vld [vmem:[#allocation8 + $0x64c] ss:$16 sps:$4 sm:$0xff]  }
 0x1c2   :  { %2392 = vmatpush1.bf16.msra.mxu0 %v3872_v46  ;;  %2564 = vmatpush1.bf16.msra.mxu1 %v3875_v45  ;;  %v3956_v46 = vld [vmem:[#allocation8 + $0x640] ss:$16 sps:$4 sm:$0xff]   ;;  %v3959_v45 = vld [vmem:[#allocation8 + $0x648] ss:$16 sps:$4 sm:$0xff]  }
 0x1c3   :  { %2393 = vmatprep.subr.bf16.mxu0 %v3880_v47  ;;  %2565 = vmatprep.subr.bf16.mxu1 %v3883_v11  ;;  %v3964_v47 = vld [vmem:[#allocation8 + $0x664] ss:$16 sps:$4 sm:$0xff]   ;;  %v3962_v11 = vld [vmem:[#allocation8 + $0x660] ss:$16 sps:$4 sm:$0xff]  }
 0x1c6   :  { %2394 = vmatpush1.bf16.msra.mxu0 %v3878_v48  ;;  %2566 = vmatpush1.bf16.msra.mxu1 %v3881_v49  ;;  %v3965_v48 = vld [vmem:[#allocation8 + $0x668] ss:$16 sps:$4 sm:$0xff]   ;;  %v3970_v49 = vld [vmem:[#allocation8 + $0x684] ss:$16 sps:$4 sm:$0xff]  }
 0x1c7   :  { %2395 = vmatprep.subr.bf16.mxu0 %v3886_v50  ;;  %2567 = vmatprep.subr.bf16.mxu1 %v3889_v52  ;;  %v3973_v50 = vld [vmem:[#allocation8 + $0x68c] ss:$16 sps:$4 sm:$0xff]   ;;  %v3968_v52 = vld [vmem:[#allocation8 + $0x680] ss:$16 sps:$4 sm:$0xff]  }
 0x1ca   :  { %2396 = vmatpush1.bf16.msra.mxu0 %v3884_v53  ;;  %2568 = vmatpush1.bf16.msra.mxu1 %v3887_v54  ;;  %v3976_v53 = vld [vmem:[#allocation8 + $0x6a4] ss:$16 sps:$4 sm:$0xff]   ;;  %v3979_v54 = vld [vmem:[#allocation8 + $0x6ac] ss:$16 sps:$4 sm:$0xff]  }
 0x1cb   :  { %2397 = vmatprep.subr.bf16.mxu0 %v3892_v55  ;;  %2569 = vmatprep.subr.bf16.mxu1 %v3895_v56  ;;  %v3974_v55 = vld [vmem:[#allocation8 + $0x6a0] ss:$16 sps:$4 sm:$0xff]   ;;  %v3977_v56 = vld [vmem:[#allocation8 + $0x6a8] ss:$16 sps:$4 sm:$0xff]  }
 0x1ce   :  { %2398 = vmatpush1.bf16.msra.mxu0 %v3890_v57  ;;  %2570 = vmatpush1.bf16.msra.mxu1 %v3893_v58  ;;  %v3982_v57 = vld [vmem:[#allocation8 + $0x6c4] ss:$16 sps:$4 sm:$0xff]   ;;  %v3985_v58 = vld [vmem:[#allocation8 + $0x6cc] ss:$16 sps:$4 sm:$0xff]  }
 0x1cf   :  { %2399 = vmatprep.subr.bf16.mxu0 %v3898_v59  ;;  %2571 = vmatprep.subr.bf16.mxu1 %v3901_v60  ;;  %v3980_v59 = vld [vmem:[#allocation8 + $0x6c0] ss:$16 sps:$4 sm:$0xff]   ;;  %v3983_v60 = vld [vmem:[#allocation8 + $0x6c8] ss:$16 sps:$4 sm:$0xff]  }
 0x1d2   :  { %2400 = vmatpush1.bf16.msra.mxu0 %v3896_v63  ;;  %2572 = vmatpush1.bf16.msra.mxu1 %v3899_v1  ;;  %v3988_v63 = vld [vmem:[#allocation8 + $0x6e4] ss:$16 sps:$4 sm:$0xff]   ;;  %v3991_v1 = vld [vmem:[#allocation8 + $0x6ec] ss:$16 sps:$4 sm:$0xff]  }
 0x1d3   :  { %2401 = vmatprep.subr.bf16.mxu0 %v3904_v2  ;;  %2573 = vmatprep.subr.bf16.mxu1 %v3907_v3  ;;  %v3986_v2 = vld [vmem:[#allocation8 + $0x6e0] ss:$16 sps:$4 sm:$0xff]   ;;  %v3989_v3 = vld [vmem:[#allocation8 + $0x6e8] ss:$16 sps:$4 sm:$0xff]  }
 0x1d6   :  { %2402 = vmatpush1.bf16.msra.mxu0 %v3902_v4  ;;  %2574 = vmatpush1.bf16.msra.mxu1 %v3905_v5  ;;  %v3994_v4 = vld [vmem:[#allocation8 + $0x704] ss:$16 sps:$4 sm:$0xff]   ;;  %v3997_v5 = vld [vmem:[#allocation8 + $0x70c] ss:$16 sps:$4 sm:$0xff]  }
 0x1d7   :  { %2403 = vmatprep.subr.bf16.mxu0 %v3910_v6  ;;  %2575 = vmatprep.subr.bf16.mxu1 %v3913_v8  ;;  %v3992_v6 = vld [vmem:[#allocation8 + $0x700] ss:$16 sps:$4 sm:$0xff]   ;;  %v3995_v8 = vld [vmem:[#allocation8 + $0x708] ss:$16 sps:$4 sm:$0xff]  }
 0x1da   :  { %2404 = vmatpush1.bf16.msra.mxu0 %v3908_v13  ;;  %2576 = vmatpush1.bf16.msra.mxu1 %v3911_v14  ;;  %v4000_v13 = vld [vmem:[#allocation8 + $0x724] ss:$16 sps:$4 sm:$0xff]   ;;  %v4003_v14 = vld [vmem:[#allocation8 + $0x72c] ss:$16 sps:$4 sm:$0xff]  }
 0x1db   :  { %2405 = vmatprep.subr.bf16.mxu0 %v3916_v16  ;;  %2577 = vmatprep.subr.bf16.mxu1 %v3919_v18  ;;  %v3998_v16 = vld [vmem:[#allocation8 + $0x720] ss:$16 sps:$4 sm:$0xff]   ;;  %v4001_v18 = vld [vmem:[#allocation8 + $0x728] ss:$16 sps:$4 sm:$0xff]  }
 0x1de   :  { %2406 = vmatpush1.bf16.msra.mxu0 %v3914_v19  ;;  %2578 = vmatpush1.bf16.msra.mxu1 %v3917_v20  ;;  %v4006_v19 = vld [vmem:[#allocation8 + $0x744] ss:$16 sps:$4 sm:$0xff]   ;;  %v4009_v20 = vld [vmem:[#allocation8 + $0x74c] ss:$16 sps:$4 sm:$0xff]  }
 0x1df   :  { %2407 = vmatprep.subr.bf16.mxu0 %v3922_v21  ;;  %2579 = vmatprep.subr.bf16.mxu1 %v3925_v22  ;;  %v4004_v21 = vld [vmem:[#allocation8 + $0x740] ss:$16 sps:$4 sm:$0xff]   ;;  %v4007_v22 = vld [vmem:[#allocation8 + $0x748] ss:$16 sps:$4 sm:$0xff]  }
 0x1e2   :  { %2408 = vmatpush1.bf16.msra.mxu0 %v3920_v23  ;;  %2580 = vmatpush1.bf16.msra.mxu1 %v3923_v24  ;;  %v4012_v23 = vld [vmem:[#allocation8 + $0x764] ss:$16 sps:$4 sm:$0xff]   ;;  %v4015_v24 = vld [vmem:[#allocation8 + $0x76c] ss:$16 sps:$4 sm:$0xff]  }
 0x1e3   :  { %2409 = vmatprep.subr.bf16.mxu0 %v3928_v25  ;;  %2581 = vmatprep.subr.bf16.mxu1 %v3931_v7  ;;  %v4010_v25 = vld [vmem:[#allocation8 + $0x760] ss:$16 sps:$4 sm:$0xff]   ;;  %v4013_v7 = vld [vmem:[#allocation8 + $0x768] ss:$16 sps:$4 sm:$0xff]  }
 0x1e6   :  { %2410 = vmatpush1.bf16.msra.mxu0 %v3926_v26  ;;  %2582 = vmatpush1.bf16.msra.mxu1 %v3929_v27  ;;  %v4018_v26 = vld [vmem:[#allocation8 + $0x784] ss:$16 sps:$4 sm:$0xff]   ;;  %v4021_v27 = vld [vmem:[#allocation8 + $0x78c] ss:$16 sps:$4 sm:$0xff]  }
 0x1e7   :  { %2411 = vmatprep.subr.bf16.mxu0 %v3934_v28  ;;  %2583 = vmatprep.subr.bf16.mxu1 %v3937_v29  ;;  %v4016_v28 = vld [vmem:[#allocation8 + $0x780] ss:$16 sps:$4 sm:$0xff]   ;;  %v4019_v29 = vld [vmem:[#allocation8 + $0x788] ss:$16 sps:$4 sm:$0xff]  }
 0x1ea   :  { %2412 = vmatpush1.bf16.msra.mxu0 %v3932_v30  ;;  %2584 = vmatpush1.bf16.msra.mxu1 %v3935_v31  ;;  %v4024_v30 = vld [vmem:[#allocation8 + $0x7a4] ss:$16 sps:$4 sm:$0xff]   ;;  %v4027_v31 = vld [vmem:[#allocation8 + $0x7ac] ss:$16 sps:$4 sm:$0xff]  }
 0x1eb   :  { %2413 = vmatprep.subr.bf16.mxu0 %v3940_v32  ;;  %2585 = vmatprep.subr.bf16.mxu1 %v3943_v33  ;;  %v4022_v32 = vld [vmem:[#allocation8 + $0x7a0] ss:$16 sps:$4 sm:$0xff]   ;;  %v4025_v33 = vld [vmem:[#allocation8 + $0x7a8] ss:$16 sps:$4 sm:$0xff]  }
 0x1ee   :  { %2414 = vmatpush1.bf16.msra.mxu0 %v3938_v34  ;;  %2586 = vmatpush1.bf16.msra.mxu1 %v3941_v35  ;;  %v4030_v34 = vld [vmem:[#allocation8 + $0x7c4] ss:$16 sps:$4 sm:$0xff]   ;;  %v4033_v35 = vld [vmem:[#allocation8 + $0x7cc] ss:$16 sps:$4 sm:$0xff]  }
 0x1ef   :  { %2426 = vmatprep.subr.bf16.mxu0 %v3946_v36  ;;  %2598 = vmatprep.subr.bf16.mxu1 %v3949_v37  ;;  %v4028_v36 = vld [vmem:[#allocation8 + $0x7c0] ss:$16 sps:$4 sm:$0xff]   ;;  %v4031_v37 = vld [vmem:[#allocation8 + $0x7c8] ss:$16 sps:$4 sm:$0xff]  }
 0x1f1   :  { %2416 = vmatmul.mubr.bf16.vlgmr.msra.gmra.mrb[8].mxu0 %v4436_v41  ;;  %2588 = vmatmul.mubr.bf16.vlgmr.msra.gmra.mrb[8].mxu1 %v4436_v41  ;;  %v3967_v41 = vld [vmem:[#allocation8 + $0x66c] ss:$16 sps:$4 sm:$0xff]  }
 0x1f2   :  { %2427 = vmatpush1.bf16.msra.mxu0 %v3944_v38  ;;  %2599 = vmatpush1.bf16.msra.mxu1 %v3947_v39  ;;  %v4036_v38 = vld [vmem:[#allocation8 + $0x7e4] ss:$16 sps:$4 sm:$0xff]   ;;  %v4039_v39 = vld [vmem:[#allocation8 + $0x7ec] ss:$16 sps:$4 sm:$0xff]  }
 0x1f3   :  { %2428 = vmatprep.subr.bf16.mxu0 %v3952_v40  ;;  %2600 = vmatprep.subr.bf16.mxu1 %v3955_v51  ;;  %v4034_v40 = vld [vmem:[#allocation8 + $0x7e0] ss:$16 sps:$4 sm:$0xff]   ;;  %v4037_v51 = vld [vmem:[#allocation8 + $0x7e8] ss:$16 sps:$4 sm:$0xff]  }
 0x1f4   :  { %2458 = vmatprep.mubr.bf16.mxu0 %v4442_v62  ;;  %2630 = vmatprep.mubr.bf16.mxu1 %v4442_v62  ;;  %v3971_v62 = vld [vmem:[#allocation8 + $0x688] ss:$16 sps:$4 sm:$0xff]  }
 0x1f6   :  { %2429 = vmatpush1.bf16.msra.mxu0 %v3950_v42  ;;  %2601 = vmatpush1.bf16.msra.mxu1 %v3953_v43  ;;  %v4040_v42 = vld [vmem:[#allocation10 + $0x40] sm:$0xff]  }
 0x1f7   :  { %2430 = vmatprep.subr.bf16.mxu0 %v3958_v0  ;;  %2602 = vmatprep.subr.bf16.mxu1 %v3961_v44  ;;  %v4041_v43 = vld [vmem:[#allocation10 + $0xc0] sm:$0xff]  }
 0x1f8   :  { %v4042_v0 = vld [vmem:[#allocation10] sm:$0xff]  }
 0x1f9   :  { %v4043_v44 = vld [vmem:[#allocation10 + $0x80] sm:$0xff]  }
 0x1fa   :  { %2431 = vmatpush1.bf16.msra.mxu0 %v3956_v46  ;;  %2603 = vmatpush1.bf16.msra.mxu1 %v3959_v45  ;;  %v4044_v46 = vld [vmem:[#allocation10 + $0x48] sm:$0xff]  }
 0x1fb   :  { %2432 = vmatprep.subr.bf16.mxu0 %v3964_v47  ;;  %2604 = vmatprep.subr.bf16.mxu1 %v3967_v41  ;;  %v4045_v45 = vld [vmem:[#allocation10 + $0xc8] sm:$0xff]  }
 0x1fc   :  { %v4046_v47 = vld [vmem:[#allocation10 + $0x8] sm:$0xff]  }
 0x1fd   :  { %v4047_v41 = vld [vmem:[#allocation10 + $0x88] sm:$0xff]  }
 0x1fe   :  { %2433 = vmatpush1.bf16.msra.mxu0 %v3962_v11  ;;  %2605 = vmatpush1.bf16.msra.mxu1 %v3965_v48  ;;  %v4048_v11 = vld [vmem:[#allocation10 + $0x50] sm:$0xff]  }
 0x1ff   :  { %2434 = vmatprep.subr.bf16.mxu0 %v3970_v49  ;;  %2606 = vmatprep.subr.bf16.mxu1 %v3973_v50  ;;  %v4049_v48 = vld [vmem:[#allocation10 + $0xd0] sm:$0xff]  }
 0x200   :  { %v4050_v49 = vld [vmem:[#allocation10 + $0x10] sm:$0xff]  }
 0x201   :  { %v4051_v50 = vld [vmem:[#allocation10 + $0x90] sm:$0xff]  }
 0x202   :  { %2435 = vmatpush1.bf16.msra.mxu0 %v3968_v52  ;;  %2607 = vmatpush1.bf16.msra.mxu1 %v3971_v62  ;;  %v4052_v52 = vld [vmem:[#allocation10 + $0x58] sm:$0xff]  }
 0x203   :  { %2436 = vmatprep.subr.bf16.mxu0 %v3976_v53  ;;  %2608 = vmatprep.subr.bf16.mxu1 %v3979_v54  ;;  %v4053_v62 = vld [vmem:[#allocation10 + $0xd8] sm:$0xff]   ;;  %v4056_v54 = vld [vmem:[#allocation10 + $0x60] sm:$0xff]  }
 0x204   :  { %v4054_v53 = vld [vmem:[#allocation10 + $0x18] sm:$0xff]  }
 0x206   :  { %2437 = vmatpush1.bf16.msra.mxu0 %v3974_v55  ;;  %2609 = vmatpush1.bf16.msra.mxu1 %v3977_v56  ;;  %v4057_v55 = vld [vmem:[#allocation10 + $0xe0] sm:$0xff]  }
 0x207   :  { %2438 = vmatprep.subr.bf16.mxu0 %v3982_v57  ;;  %2610 = vmatprep.subr.bf16.mxu1 %v3985_v58  ;;  %v4058_v56 = vld [vmem:[#allocation10 + $0x20] sm:$0xff]   ;;  %v4060_v58 = vld [vmem:[#allocation10 + $0x68] sm:$0xff]  }
 0x208   :  { %v4059_v57 = vld [vmem:[#allocation10 + $0xa0] sm:$0xff]  }
 0x20a   :  { %2439 = vmatpush1.bf16.msra.mxu0 %v3980_v59  ;;  %2611 = vmatpush1.bf16.msra.mxu1 %v3983_v60  ;;  %v4061_v59 = vld [vmem:[#allocation10 + $0xe8] sm:$0xff]  }
 0x20b   :  { %2440 = vmatprep.subr.bf16.mxu0 %v3988_v63  ;;  %2612 = vmatprep.subr.bf16.mxu1 %v3991_v1  ;;  %v4062_v60 = vld [vmem:[#allocation10 + $0x28] sm:$0xff]   ;;  %v4064_v1 = vld [vmem:[#allocation10 + $0x70] sm:$0xff]  }
 0x20c   :  { %v4063_v63 = vld [vmem:[#allocation10 + $0xa8] sm:$0xff]  }
 0x20e   :  { %2441 = vmatpush1.bf16.msra.mxu0 %v3986_v2  ;;  %2613 = vmatpush1.bf16.msra.mxu1 %v3989_v3  ;;  %v4065_v2 = vld [vmem:[#allocation10 + $0xf0] sm:$0xff]  }
 0x20f   :  { %2442 = vmatprep.subr.bf16.mxu0 %v3994_v4  ;;  %2614 = vmatprep.subr.bf16.mxu1 %v3997_v5  ;;  %v4066_v3 = vld [vmem:[#allocation10 + $0x30] sm:$0xff]   ;;  %v4068_v5 = vld [vmem:[#allocation10 + $0x78] sm:$0xff]  }
 0x210   :  { %v4067_v4 = vld [vmem:[#allocation10 + $0xb0] sm:$0xff]  }
 0x212   :  { %2443 = vmatpush1.bf16.msra.mxu0 %v3992_v6  ;;  %2615 = vmatpush1.bf16.msra.mxu1 %v3995_v8  ;;  %v4069_v6 = vld [vmem:[#allocation10 + $0xf8] sm:$0xff]  }
 0x213   :  { %2444 = vmatprep.subr.bf16.mxu0 %v4000_v13  ;;  %2616 = vmatprep.subr.bf16.mxu1 %v4003_v14  ;;  %v4070_v8 = vld [vmem:[#allocation10 + $0x38] sm:$0xff]   ;;  %v995_v14 = vld [vmem:[%s4487_s4] sm:$0xf] }
 0x214   :  { %v4071_v13 = vld [vmem:[#allocation10 + $0xb8] sm:$0xff]  }
 0x216   :  { %2445 = vmatpush1.bf16.msra.mxu0 %v3998_v16  ;;  %2617 = vmatpush1.bf16.msra.mxu1 %v4001_v18  ;;  %v1000_v16 = vrot.slane %v995_v14, %v185_v10  ;;  %v1008_v18 = vrot.slane %v995_v14, %v193_v15 }
 0x217   :  { %2446 = vmatprep.subr.bf16.mxu0 %v4006_v19  ;;  %2618 = vmatprep.subr.bf16.mxu1 %v4009_v20  ;;  %v1004_v19 = vrot.slane %v995_v14, %v189_v12  ;;  %v1012_v20 = vrot.slane %v995_v14, %v197_v17 }
 0x21a   :  { %2447 = vmatpush1.bf16.msra.mxu0 %v4004_v21  ;;  %2619 = vmatpush1.bf16.msra.mxu1 %v4007_v22 }
 0x21b   :  { %2448 = vmatprep.subr.bf16.mxu0 %v4012_v23  ;;  %2620 = vmatprep.subr.bf16.mxu1 %v4015_v24 }
 0x21e   :  { %2449 = vmatpush1.bf16.msra.mxu0 %v4010_v25  ;;  %2621 = vmatpush1.bf16.msra.mxu1 %v4013_v7 }
 0x21f   :  { %2450 = vmatprep.subr.bf16.mxu0 %v4018_v26  ;;  %2622 = vmatprep.subr.bf16.mxu1 %v4021_v27 }
 0x222   :  { %2451 = vmatpush1.bf16.msra.mxu0 %v4016_v28  ;;  %2623 = vmatpush1.bf16.msra.mxu1 %v4019_v29 }
 0x223   :  { %2452 = vmatprep.subr.bf16.mxu0 %v4024_v30  ;;  %2624 = vmatprep.subr.bf16.mxu1 %v4027_v31 }
 0x226   :  { %2453 = vmatpush1.bf16.msra.mxu0 %v4022_v32  ;;  %2625 = vmatpush1.bf16.msra.mxu1 %v4025_v33 }
 0x227   :  { %2454 = vmatprep.subr.bf16.mxu0 %v4030_v34  ;;  %2626 = vmatprep.subr.bf16.mxu1 %v4033_v35 }
 0x22a   :  { %2455 = vmatpush1.bf16.msra.mxu0 %v4028_v36  ;;  %2627 = vmatpush1.bf16.msra.mxu1 %v4031_v37 }
 0x22b   :  { %2456 = vmatprep.subr.bf16.mxu0 %v4036_v38  ;;  %2628 = vmatprep.subr.bf16.mxu1 %v4039_v39 }
 0x22e   :  { %2457 = vmatpush1.bf16.msra.mxu0 %v4034_v40  ;;  %2629 = vmatpush1.bf16.msra.mxu1 %v4037_v51 }
 0x22f   :  { %3533 = vmatprep.subr.bf16.mxu0 %v4040_v42  ;;  %3555 = vmatprep.subr.bf16.mxu1 %v4041_v43  ;;  %v4072_v43 = vld [vmem:[#allocation11] sm:$0xff]  }
 0x231   :  { %2459 = vmatmul.mubr.bf16.vlgmr.msra.gmra.mrb[8].mxu0 %v4440_v61  ;;  %2631 = vmatmul.mubr.bf16.vlgmr.msra.gmra.mrb[8].mxu1 %v4440_v61  ;;  %v4055_v61 = vld [vmem:[#allocation10 + $0x98] sm:$0xff]  }
 0x232   :  { %3534 = vmatpush3.bf16.msra.mxu0 %v4042_v0  ;;  %3556 = vmatpush3.bf16.msra.mxu1 %v4043_v44  ;;  %v4271_v0 = vmov 0.0   ;;  %v4073_v44 = vld [vmem:[#allocation11 + $0x8] sm:$0xff]  }
 0x233   :  { %3535 = vmatprep.subr.bf16.mxu0 %v4044_v46  ;;  %3557 = vmatprep.subr.bf16.mxu1 %v4045_v45  ;;  %v4074_v46 = vld [vmem:[#allocation11 + $0x10] sm:$0xff]   ;;  %v4075_v45 = vld [vmem:[#allocation11 + $0x18] sm:$0xff]  }
 0x236   :  { %3536 = vmatpush3.bf16.msra.mxu0 %v4046_v47  ;;  %3558 = vmatpush3.bf16.msra.mxu1 %v4047_v41  ;;  %v4076_v47 = vld [vmem:[#allocation11 + $0x20] sm:$0xff]   ;;  %v4077_v41 = vld [vmem:[#allocation11 + $0x28] sm:$0xff]  }
 0x237   :  { %3537 = vmatprep.subr.bf16.mxu0 %v4048_v11  ;;  %3559 = vmatprep.subr.bf16.mxu1 %v4049_v48  ;;  %v4078_v11 = vld [vmem:[#allocation11 + $0x30] sm:$0xff]   ;;  %v4079_v48 = vld [vmem:[#allocation11 + $0x38] sm:$0xff]  }
 0x23a   :  { %3538 = vmatpush3.bf16.msra.mxu0 %v4050_v49  ;;  %3560 = vmatpush3.bf16.msra.mxu1 %v4051_v50 }
 0x23b   :  { %3539 = vmatprep.subr.bf16.mxu0 %v4052_v52  ;;  %3561 = vmatprep.subr.bf16.mxu1 %v4053_v62  ;;  %v3488_v52 = vld [vmem:[%s4489_s6] ss:$0 sm:$0xff] }
 0x23e   :  { %3540 = vmatpush3.bf16.msra.mxu0 %v4054_v53  ;;  %3562 = vmatpush3.bf16.msra.mxu1 %v4055_v61 }
 0x23f   :  { %3541 = vmatprep.subr.bf16.mxu0 %v4056_v54  ;;  %3563 = vmatprep.subr.bf16.mxu1 %v4057_v55 }
 0x242   :  { %3542 = vmatpush3.bf16.msra.mxu0 %v4058_v56  ;;  %3564 = vmatpush3.bf16.msra.mxu1 %v4059_v57 }
 0x243   :  { %3543 = vmatprep.subr.bf16.mxu0 %v4060_v58  ;;  %3565 = vmatprep.subr.bf16.mxu1 %v4061_v59 }
 0x246   :  { %3544 = vmatpush3.bf16.msra.mxu0 %v4062_v60  ;;  %3566 = vmatpush3.bf16.msra.mxu1 %v4063_v63 }
 0x247   :  { %3545 = vmatprep.subr.bf16.mxu0 %v4064_v1  ;;  %3567 = vmatprep.subr.bf16.mxu1 %v4065_v2 }
 0x24a   :  { %3546 = vmatpush3.bf16.msra.mxu0 %v4066_v3  ;;  %3568 = vmatpush3.bf16.msra.mxu1 %v4067_v4 }
 0x24b   :  { %3547 = vmatprep.subr.bf16.mxu0 %v4068_v5  ;;  %3569 = vmatprep.subr.bf16.mxu1 %v4069_v6 }
 0x24e   :  { %3548 = vmatpush3.bf16.msra.mxu0 %v4070_v8  ;;  %3570 = vmatpush3.bf16.msra.mxu1 %v4071_v13 }
 0x24f   :  { %3586 = vmatprep.subr.bf16.mxu0 %v4271_v0 }
 0x304   :  { %v2460_v21 = vpop.f32.mrb[8].mxu0  ;;  %v2632_v22 = vpop.f32.mrb[8].mxu1 }
 0x305   :  { %v3606_v23 = vadd.f32 %v2460_v21, %v1000_v16  ;;  %v3610_v24 = vadd.f32 %v2632_v22, %v1008_v18  ;;  %v2462_v25 = vpop.f32.mrb[9].mxu0  ;;  %v2634_v7 = vpop.f32.mrb[9].mxu1 }
 0x306   :  { %v3607_v26 = vadd.f32 %v2462_v25, %v1004_v19  ;;  %v3611_v27 = vadd.f32 %v2634_v7, %v1012_v20  ;;  %v2464_v28 = vpop.f32.mrb[10].mxu0  ;;  %v2636_v29 = vpop.f32.mrb[10].mxu1 }
 0x307   :  { %v3608_v10 = vadd.f32 %v2464_v28, %v1000_v16  ;;  %v3612_v30 = vadd.f32 %v2636_v29, %v1008_v18  ;;  %v2466_v31 = vpop.f32.mrb[11].mxu0  ;;  %v2638_v15 = vpop.f32.mrb[11].mxu1  ;;  %v2641_v12 = vmax.f32 %v3606_v23, 0.0  ;;  %v2643_v34 = vmax.f32 %v3610_v24, 0.0 }
 0x308   :  { %v3609_v32 = vadd.f32 %v2466_v31, %v1004_v19  ;;  %v3613_v33 = vadd.f32 %v2638_v15, %v1012_v20  ;;  %v2642_v35 = vmax.f32 %v3607_v26, 0.0  ;;  %v2644_v36 = vmax.f32 %v3611_v27, 0.0 }
 0x309   :  { %v2645_v9 = vmax.f32 %v3608_v10, 0.0  ;;  %v2647_v17 = vmax.f32 %v3612_v30, 0.0 }
 0x30a   :  { %v2646_v37 = vmax.f32 %v3609_v32, 0.0  ;;  %v2648_v38 = vmax.f32 %v3613_v33, 0.0 }
 0x30b   :  { %v2649_v39 = vpack.c.bf16 %v2645_v9, %v2641_v12  ;;  %v2651_v40 = vpack.c.bf16 %v2647_v17, %v2643_v34  ;;  %v3523_v12 = vld [vmem:[%s4491_s8] ss:$0 sm:$0xff] }
 0x30c   :  { %v2650_v51 = vpack.c.bf16 %v2646_v37, %v2642_v35  ;;  %v2652_v42 = vpack.c.bf16 %v2648_v38, %v2644_v36 }
 0x30e   :  { %2948 = vmatprep.mubr.bf16.mxu0 %v2650_v51  ;;  %2989 = vmatprep.mubr.bf16.mxu1 %v2652_v42 }
 0x30f   :  { %2949 = vmatmul.mubr.bf16.vlgmr.msra.gmra.mrb[12].mxu0 %v2649_v39  ;;  %2990 = vmatmul.mubr.bf16.vlgmr.msra.gmra.mrb[12].mxu1 %v2651_v40 }
 0x310   :  { %3587 = vmatpush3.bf16.msra.mxu0 %v4072_v43  ;;  %3602 = vmatprep.mubr.msk.bf16.mxu0 %vm4272_vm0, %v4271_v0 }
 0x311   :  { %3588 = vmatprep.subr.bf16.mxu0 %v4271_v0 }
 0x314   :  { %3589 = vmatpush3.bf16.msra.mxu0 %v4073_v44 }
 0x315   :  { %3590 = vmatprep.subr.bf16.mxu0 %v4271_v0 }
 0x318   :  { %3591 = vmatpush3.bf16.msra.mxu0 %v4074_v46 }
 0x319   :  { %3592 = vmatprep.subr.bf16.mxu0 %v4271_v0 }
 0x31c   :  { %3593 = vmatpush3.bf16.msra.mxu0 %v4075_v45 }
 0x31d   :  { %3594 = vmatprep.subr.bf16.mxu0 %v4271_v0 }
 0x320   :  { %3595 = vmatpush3.bf16.msra.mxu0 %v4076_v47 }
 0x321   :  { %3596 = vmatprep.subr.bf16.mxu0 %v4271_v0 }
 0x324   :  { %3597 = vmatpush3.bf16.msra.mxu0 %v4077_v41 }
 0x325   :  { %3598 = vmatprep.subr.bf16.mxu0 %v4271_v0 }
 0x328   :  { %3599 = vmatpush3.bf16.msra.mxu0 %v4078_v11 }
 0x329   :  { %3600 = vmatprep.subr.bf16.mxu0 %v4271_v0 }
 0x32c   :  { %3601 = vmatpush3.bf16.msra.mxu0 %v4079_v48 }
 0x3e2   :  { %v3549_v49 = vpop.f32.mrb[12].mxu0  ;;  %v3571_v50 = vpop.f32.mrb[12].mxu1 }
 0x3e3   :  { %v3550_v62 = vpop.f32.mrb[13].mxu0  ;;  %v3572_v53 = vpop.f32.mrb[13].mxu1 }
 0x3e4   :  { %v3551_v61 = vadd.f32 %v3550_v62, %v3549_v49  ;;  %v3573_v54 = vadd.f32 %v3572_v53, %v3571_v50  ;;  %v3552_v55 = vpop.f32.mrb[14].mxu0  ;;  %v3574_v56 = vpop.f32.mrb[14].mxu1 }
 0x3e5   :  { %v3553_v57 = vpop.f32.mrb[15].mxu0  ;;  %v3575_v58 = vpop.f32.mrb[15].mxu1 }
 0x3e6   :  { %v2951_v59 = vadd.f32 %v3551_v61, %v3488_v52  ;;  %v3554_v60 = vadd.f32 %v3553_v57, %v3552_v55  ;;  %v3576_v63 = vadd.f32 %v3575_v58, %v3574_v56 }
 0x3e8   :  { %v2992_v1 = vadd.f32 %v3573_v54, %v2951_v59  ;;  %v2954_v2 = vadd.f32 %v3554_v60, %v3488_v52 }
 0x3ea   :  { %v3521_v3 = vmul.f32 -1.442695, %v2992_v1  ;;  %v2995_v4 = vadd.f32 %v3576_v63, %v2954_v2 }
 0x3ec   :  { %4080 = vpow2.f32 %v3521_v3  ;;  %v3522_v5 = vmul.f32 -1.442695, %v2995_v4 }
 0x3ee   :  { %4082 = vpow2.f32 %v3522_v5 }
 0x3f6   :  { %v4081_v6 = vpop.eup %4080 }
 0x3f7   :  { %v3004_v8 = vadd.f32 1.0, %v4081_v6 }
 0x3f8   :  { %v4083_v13 = vpop.eup %4082 }
 0x3f9   :  { %4084 = vrcp.f32 %v3004_v8  ;;  %v3005_v14 = vadd.f32 1.0, %v4083_v13 }
 0x3fb   :  { %4086 = vrcp.f32 %v3005_v14 }
 0x403   :  { %v4085_v16 = vpop.eup %4084 }
 0x404   :  { %v3010_v18 = vrot.slane %v4085_v16, 4 }
 0x405   :  { %v4087_v19 = vpop.eup %4086 }
 0x406   :  { %v3016_v20 = vrot.slane %v4087_v19, 4  ;;  %v3011_v21 = vadd.f32 %v4085_v16, %v3010_v18 }
 0x408   :  { %v3012_v22 = vrot.slane %v3011_v21, 2  ;;  %v3017_v23 = vadd.f32 %v4087_v19, %v3016_v20 }
 0x40a   :  { %v3013_v24 = vadd.f32 %v3012_v22, %v3011_v21  ;;  %v3018_v25 = vrot.slane %v3017_v23, 2 }
 0x40c   :  { %v3014_v7 = vrot.slane %v3013_v24, 1  ;;  %v3019_v26 = vadd.f32 %v3018_v25, %v3017_v23 }
 0x40e   :  { %v3015_v27 = vadd.f32 %v3014_v7, %v3013_v24  ;;  %v3020_v28 = vrot.slane %v3019_v26, 1 }
 0x410   :  { %v3021_v29 = vadd.f32 %v3020_v28, %v3019_v26  ;;  %v3022_v10 = vpack.c.bf16 %v3015_v27, %v3015_v27 }
 0x412   :  { %v3023_v30 = vpack.c.bf16 %v3021_v29, %v3021_v29  ;;  %v3049_v31 = vunpack.c.l.b16 %v3022_v10 }
 0x414   :  { %v3050_v15 = vunpack.c.l.b16 %v3023_v30 }
 0x416   :  { %v3052_v32 = vsel %vm3051_vm1, %v3050_v15, %v3049_v31 }
 0x417   :  { %v3053_v33 = vpack.c.b16 %v3052_v32, %v3052_v32 }
 0x419   :  { %3603 = vmatmul.mubr.bf16.vlgmr.msra.gmra.mrb[16].mxu0 %v3053_v33 }
 0x4ec   :  { %v3137_v34 = vpop.f32.mrb[16].mxu0 }
 0x4ed   :  { %v3138_v9 = vadd.f32 %v3523_v12, %v3137_v34  ;;  %v3604_v17 = vpop.f32.mrb[17].mxu0 }
 0x4ee   :  { %v3140_v35 = vpop.f32.mrb[18].mxu0 }
 0x4ef   :  { %v3532_v36 = vmul.f32 -1.442695, %v3138_v9  ;;  %v3605_v37 = vpop.f32.mrb[19].mxu0 }
 0x4f1   :  { %4088 = vpow2.f32 %v3532_v36 }
 0x4fb   :  { %v4089_v38 = vpop.eup %4088 }
 0x4fc   :  { %v3146_v39 = vadd.f32 1.0, %v4089_v38 }
 0x4fe   :  { %4090 = vrcp.f32 %v3146_v39 }
 0x508   :  { %v4091_v40 = vpop.eup %4090 }
 0x509   :  { %3149 = vst [vmem:[#allocation13] sm:$0x3] %v4091_v40 }
 0x50a   :  { %4235 = shalt.err (!%p4232_p10)
}
 0x50b   :  { %s4236_s25 = scalar_lea.hbm %s4492_s9, 32 }
 0x50c   :  { %p4237_p11 = scmp.ne.s32.totalorder %s4492_s9, %s4236_s25  ;;  %p4240_p12 = scmp.lt.u32.totalorder %s4236_s25, %s4492_s9 }
 0x50e   :  { %p4242_p13 = pnand %p4240_p12, %p4237_p11 }
 0x510   :  { %4245 = shalt.err (!%p4242_p13)
}
 0x511   :  { %3159 = dma.vmem_to_hbm [thread:$0]  %s3157_s21, 32, %s4492_s9, [#allocation4]  }
 0x512   :  { %4254 = dma.done.wait [#allocation4], 32  }
 0x513   :  { %4255 = vsyncadd [#allocation4], 4294967264 }
 0x514   :  { %3163 = vsyncpa [#allocation3], 1 }
 0x515   :  { %3164 = vsyncpa [#allocation6], 1 }
 0x516   :  { %3165 = vsyncpa [#allocation9], 1 }
 0x517   :  { %3166 = vsyncpa [#allocation12], 1 }
 0x518   :  { %3167 = vsyncpa [#allocation4], 1 }

</bundles_post_ra>
